<compile_context>
chip_gen: v5e
topology: v5e:2x2
jax: 0.10.0
libtpu: 0.0.40
codegen_flags: <defaults>
</compile_context>

<pallas_src>
import numpy as np
import jax
import jax.numpy as jnp
from jax import lax
from jax.experimental import pallas as pl
from jax.experimental.pallas import tpu as pltpu

Z_DIM = 16
HIDDEN_DIMS = (128, 256, 512)
HIDDEN_DIM_OPS = 256
N_NODES = 7
N_OPS = 5
TAU = 1.0

NN = N_NODES * N_NODES          # 49 flattened adjacency lanes
NK = N_NODES * N_OPS            # 35 flattened per-node op-logit lanes
PACK = 128                      # lane-dense packed block width
OP_OFF = 64                     # lane offset of the op one-hot inside the pack


# ----------------------------------------------------------------------------
# Kernel: MLP trunk + fused heads + edge sampling + GCNConv + op sampling,
#         one batch tile per grid step, no scratch, single dense store.
# ----------------------------------------------------------------------------
def _generator_kernel(
    z_ref, noise_ref,
    w1_ref, w2_ref, w3_ref, wh_ref, ball_ref, misc_ref,
    dsum_ref, esrc_ref, edst_ref, ma_ref, mx_ref, mr_ref,
    csel_ref, spread_ref, padj_ref, pop_ref,
    out_ref,
):
    f32 = jnp.float32
    bf16 = jnp.bfloat16

    # packed biases: [b1 | b2 | b3 | b_heads] (lane-128-aligned segments)
    b1 = ball_ref[:, 0:128]
    b2 = ball_ref[:, 128:384]
    b3 = ball_ref[:, 384:896]
    bh = ball_ref[:, 896:1152]

    # packed tiny constants
    triu = misc_ref[0:1, 0:NN]               # strict upper-triangle mask
    eyev = misc_ref[1:2, 0:NN]               # self-loop mask
    bgcn = misc_ref[2:3, 0:NK]               # GCNConv bias, node-tiled
    pos = misc_ref[3:4, 0:NK]                # within-node op position iota

    # packed noise: logistic (edges) lanes 0:49, Gumbel (ops) lanes 64:99
    noise_e = noise_ref[:, 0:NN]
    noise_o = noise_ref[:, OP_OFF:OP_OFF + NK]

    # ---- MLP trunk (Tanh); bf16 MXU operands, f32 accumulation & activations --
    # (on v6e/v7x the tanh could also run in bf16; kept f32 for v5e portability)
    h = jnp.tanh(jnp.dot(z_ref[...].astype(bf16), w1_ref[...],
                         preferred_element_type=f32) + b1)
    h = jnp.tanh(jnp.dot(h.astype(bf16), w2_ref[...],
                         preferred_element_type=f32) + b2)
    h = jnp.tanh(jnp.dot(h.astype(bf16), w3_ref[...],
                         preferred_element_type=f32) + b3)

    # ---- fused heads: one (BT,512)x(512,256) matmul ---------------------------
    #   lanes   0:49  -> symmetrized edge logit difference (class1 - class0)
    #   lanes 128:163 -> per-node op logits (nodes_layer folded through GCN W)
    head = jnp.dot(h.astype(bf16), wh_ref[...], preferred_element_type=f32) + bh
    edge_logit = head[:, 0:NN]
    xw = head[:, 128:128 + NK]

    # ---- edge sampling: hard 2-class Gumbel-softmax == logistic threshold ----
    edge = ((edge_logit + noise_e) > 0.0).astype(f32)
    adj_tri = edge * triu                     # torch.triu(adj, diagonal=1)

    # ---- GCNConv: add self loops + symmetric in-degree normalization ---------
    ahat = adj_tri + eyev                                             # A + I
    deg = jnp.dot(ahat, dsum_ref[...], preferred_element_type=f32)    # (BT, 7)
    dinv = lax.rsqrt(deg)                     # deg >= 1 thanks to self loops
    nadj = (ahat
            * jnp.dot(dinv, esrc_ref[...], preferred_element_type=f32)
            * jnp.dot(dinv, edst_ref[...], preferred_element_type=f32))
    # out[b, dst, k] = sum_src nadj[b, src, dst] * xw[b, src, k] via constant
    # expand/reduce matmuls (no in-kernel reshapes of unaligned blocks)
    prod = (jnp.dot(nadj, ma_ref[...], preferred_element_type=f32)
            * jnp.dot(xw, mx_ref[...], preferred_element_type=f32))
    op_emb = jnp.dot(prod, mr_ref[...], preferred_element_type=f32) + bgcn

    # ---- hard Gumbel-softmax over the 5 op classes, fully in vregs ------------
    y = (op_emb + noise_o) / TAU
    best_v = jnp.dot(y, csel_ref[0], preferred_element_type=f32)      # (BT, 7)
    best_i = jnp.zeros_like(best_v)
    for k in range(1, N_OPS):                 # static 5-way unroll
        v = jnp.dot(y, csel_ref[k], preferred_element_type=f32)
        take = v > best_v                     # strict '>' => first-argmax on ties
        best_v = jnp.where(take, v, best_v)
        best_i = jnp.where(take, jnp.float32(k), best_i)
    idx35 = jnp.dot(best_i, spread_ref[...], preferred_element_type=f32)
    oneh = (idx35 == pos).astype(f32)

    # ---- single lane-dense packed store: adj @ 0:48, one-hot @ 64:98 ----------
    out_ref[...] = (jnp.dot(adj_tri, padj_ref[...], preferred_element_type=f32)
                    + jnp.dot(oneh, pop_ref[...], preferred_element_type=f32))


# ----------------------------------------------------------------------------
# Trace-time constants / weight folding
# ----------------------------------------------------------------------------
def _sym49():
    """S s.t. (row-major flat logits) @ S == flattened (A + A^T) / 2."""
    n, nn = N_NODES, N_NODES * N_NODES
    p = np.arange(nn)
    r, c = p // n, p % n
    s = np.zeros((nn, nn), np.float32)
    s[p, p] += 0.5
    s[p, c * n + r] += 0.5
    return s


def _graph_constants():
    n, kops = N_NODES, N_OPS
    nn, nk, m = n * n, n * kops, n * n * kops
    p = np.arange(nn)
    src, dst = p // n, p % n
    triu = (dst > src).astype(np.float32)
    eyev = (dst == src).astype(np.float32)
    dsum = np.zeros((nn, n), np.float32); dsum[p, dst] = 1.0          # in-degree
    esrc = np.zeros((n, nn), np.float32); esrc[src, p] = 1.0          # dinv[src]
    edst = np.zeros((n, nn), np.float32); edst[dst, p] = 1.0          # dinv[dst]
    q = np.arange(m)
    qs, qd, qk = q // (n * kops), (q % (n * kops)) // kops, q % kops
    ma = np.zeros((nn, m), np.float32); ma[qs * n + qd, q] = 1.0      # expand nadj
    mx = np.zeros((nk, m), np.float32); mx[qs * kops + qk, q] = 1.0   # expand xW
    mr = np.zeros((m, nk), np.float32); mr[q, qd * kops + qk] = 1.0   # reduce src
    # per-node op-column extraction / spread (for the in-vreg 5-class argmax)
    csel = np.zeros((kops, nk, n), np.float32)
    spread = np.zeros((n, nk), np.float32)
    pos = np.zeros((nk,), np.float32)
    for g in range(n):
        for k in range(kops):
            csel[k, g * kops + k, g] = 1.0
            spread[g, g * kops + k] = 1.0
            pos[g * kops + k] = float(k)
    # lane-dense output placement matrices
    padj = np.zeros((nn, PACK), np.float32)
    padj[np.arange(nn), np.arange(nn)] = 1.0
    pop = np.zeros((nk, PACK), np.float32)
    pop[np.arange(nk), OP_OFF + np.arange(nk)] = 1.0
    return dict(triu=triu, eyev=eyev, dsum=dsum, esrc=esrc, edst=edst,
                ma=ma, mx=mx, mr=mr, csel=csel, spread=spread, pos=pos,
                padj=padj, pop=pop)


def _round_up(x, m):
    return ((x + m - 1) // m) * m


# ----------------------------------------------------------------------------
# Wrapper
# ----------------------------------------------------------------------------
def generator_forward(params, z, key):
    """Returns (op_onehot (B,7,5), adj_mat (B,7,7), batch (B*7,)) — dense graphs."""
    w1, b1, w2, b2, w3, b3, we, be, wn, bn, wg, bg = params
    B = z.shape[0]
    n, kops, hops = N_NODES, N_OPS, HIDDEN_DIM_OPS
    nn, nk = NN, NK
    f32, bf16 = jnp.float32, jnp.bfloat16

    # --- fold symmetrization + 2-class softmax into a single edge logit diff ---
    sym = jnp.asarray(_sym49())
    w_edge = (we[:, nn:2 * nn] - we[:, :nn]) @ sym                    # (512, 49)
    b_edge = (be[:, nn:2 * nn] - be[:, :nn]) @ sym                    # (1, 49)

    # --- fold the GCNConv weight into the nodes head ----------------------------
    wng = jnp.einsum('dnh,hk->dnk', wn.reshape(HIDDEN_DIMS[-1], n, hops),
                     wg).reshape(HIDDEN_DIMS[-1], nk)                 # (512, 35)
    bng = (bn.reshape(n, hops) @ wg).reshape(1, nk)                   # (1, 35)
    bgcn = jnp.tile(bg.reshape(1, kops), (1, n))                      # (1, 35)

    # --- fused lane-aligned heads ------------------------------------------------
    wh = jnp.zeros((HIDDEN_DIMS[-1], 256), f32)
    wh = wh.at[:, 0:nn].set(w_edge).at[:, 128:128 + nk].set(wng)
    bh = jnp.zeros((1, 256), f32)
    bh = bh.at[:, 0:nn].set(b_edge).at[:, 128:128 + nk].set(bng)

    # --- pack all biases / tiny constants into lane-aligned slabs ---------------
    b_all = jnp.concatenate([b1, b2, b3, bh], axis=1)                 # (1, 1152)
    c = _graph_constants()
    misc = jnp.zeros((8, PACK), f32)
    misc = (misc.at[0, :nn].set(jnp.asarray(c['triu']))
                .at[1, :nn].set(jnp.asarray(c['eyev']))
                .at[2, :nk].set(bgcn[0])
                .at[3, :nk].set(jnp.asarray(c['pos'])))

    # --- bf16 MXU operands (accumulation stays f32 inside the kernel) -----------
    w1b, w2b, w3b, whb = (w.astype(bf16) for w in (w1, w2, w3, wh))

    # --- batch tiling: >=2 grid steps for large B so v7x can use both TCs -------
    half = max((B + 1) // 2, 1)
    BT = min(256, _round_up(half, 8))
    Bp = _round_up(max(B, 1), BT)
    num_tiles = Bp // BT
    zp = jnp.pad(z, ((0, Bp - B), (0, 0))) if Bp != B else z

    # --- pre-sampled noise, packed lane-dense ------------------------------------
    # (in-kernel pltpu.prng_* is not available in interpret mode; the noise is
    #  tiny, so generating it with jax.random outside the kernel is essentially
    #  free.)  G1 - G0 ~ Logistic(0, 1) for the 2-class edge sample.
    ke, ko = jax.random.split(key)
    noise = jnp.zeros((Bp, PACK), f32)
    noise = (noise.at[:, :nn].set(jax.random.logistic(ke, (Bp, nn), f32))
                  .at[:, OP_OFF:OP_OFF + nk].set(
                      jax.random.gumbel(ko, (Bp, nk), f32)))

    consts = [w1b, w2b, w3b, whb, b_all, misc,
              jnp.asarray(c['dsum']), jnp.asarray(c['esrc']),
              jnp.asarray(c['edst']), jnp.asarray(c['ma']),
              jnp.asarray(c['mx']), jnp.asarray(c['mr']),
              jnp.asarray(c['csel']), jnp.asarray(c['spread']),
              jnp.asarray(c['padj']), jnp.asarray(c['pop'])]

    def _const_spec(a):
        zeros = (0,) * a.ndim
        return pl.BlockSpec(a.shape, lambda b, _z=zeros: _z)

    def _row_spec(width):
        return pl.BlockSpec((BT, width), lambda b: (b, 0))

    packed = pl.pallas_call(
        _generator_kernel,
        grid=(num_tiles,),
        in_specs=[_row_spec(Z_DIM), _row_spec(PACK)]
                 + [_const_spec(a) for a in consts],
        out_specs=_row_spec(PACK),
        out_shape=jax.ShapeDtypeStruct((Bp, PACK), f32),
        compiler_params=pltpu.CompilerParams(
            dimension_semantics=("parallel",)),
    )(zp, noise, *consts)

    adj_mat = packed[:B, :nn].reshape(B, n, n)
    op_onehot = packed[:B, OP_OFF:OP_OFF + nk].reshape(B, n, kops)
    # batch vector for the dense (unpruned) graphs
    batch = jnp.repeat(jnp.arange(B, dtype=jnp.int32), n)
    return op_onehot, adj_mat, batch


# ----------------------------------------------------------------------------
# Deterministic parameter init (synthetic; shapes follow the module __init__)
# ----------------------------------------------------------------------------
def init_params(key):
    ks = jax.random.split(key, 6)

    def lin(k, fan_in, fan_out):
        kw, kb = jax.random.split(k)
        w = jax.random.normal(kw, (fan_in, fan_out), jnp.float32) / jnp.sqrt(
            jnp.float32(fan_in))
        b = jax.random.normal(kb, (1, fan_out), jnp.float32) * 0.01
        return w, b

    w1, b1 = lin(ks[0], Z_DIM, HIDDEN_DIMS[0])
    w2, b2 = lin(ks[1], HIDDEN_DIMS[0], HIDDEN_DIMS[1])
    w3, b3 = lin(ks[2], HIDDEN_DIMS[1], HIDDEN_DIMS[2])
    we, be = lin(ks[3], HIDDEN_DIMS[2], 2 * N_NODES * N_NODES)      # edges_layer
    wn, bn = lin(ks[4], HIDDEN_DIMS[2], N_NODES * HIDDEN_DIM_OPS)   # nodes_layer
    wg, bg = lin(ks[5], HIDDEN_DIM_OPS, N_OPS)                      # GCNConv mapper
    return (w1, b1, w2, b2, w3, b3, we, be, wn, bn, wg, bg)


if __name__ == "__main__":
    key = jax.random.PRNGKey(0)
    kp, kz, ks = jax.random.split(key, 3)
    params = init_params(kp)
    B = 4
    z = jax.random.normal(kz, (B, Z_DIM), jnp.float32)

    op_onehot, adj_mat, batch = generator_forward(params, z, ks)
    jax.block_until_ready((op_onehot, adj_mat, batch))
    print("KERNEL_OK")
</pallas_src>

<mosaic_0001>
module attributes {stable_mosaic.version = 11 : i64} {
  func.func @_generator_kernel(%arg0: i32, %arg1: memref<8x16xf32, #tpu.memory_space<vmem>>, %arg2: memref<8x128xf32, #tpu.memory_space<vmem>>, %arg3: memref<16x128xbf16, #tpu.memory_space<vmem>>, %arg4: memref<128x256xbf16, #tpu.memory_space<vmem>>, %arg5: memref<256x512xbf16, #tpu.memory_space<vmem>>, %arg6: memref<512x256xbf16, #tpu.memory_space<vmem>>, %arg7: memref<1x1152xf32, #tpu.memory_space<vmem>>, %arg8: memref<8x128xf32, #tpu.memory_space<vmem>>, %arg9: memref<49x7xf32, #tpu.memory_space<vmem>>, %arg10: memref<7x49xf32, #tpu.memory_space<vmem>>, %arg11: memref<7x49xf32, #tpu.memory_space<vmem>>, %arg12: memref<49x245xf32, #tpu.memory_space<vmem>>, %arg13: memref<35x245xf32, #tpu.memory_space<vmem>>, %arg14: memref<245x35xf32, #tpu.memory_space<vmem>>, %arg15: memref<5x35x7xf32, #tpu.memory_space<vmem>>, %arg16: memref<7x35xf32, #tpu.memory_space<vmem>>, %arg17: memref<49x128xf32, #tpu.memory_space<vmem>>, %arg18: memref<35x128xf32, #tpu.memory_space<vmem>>, %arg19: memref<8x128xf32, #tpu.memory_space<vmem>>) attributes {dimension_semantics = [#tpu.dimension_semantics<parallel>], iteration_bounds = array<i64: 1>, scalar_prefetch = 0 : i64, scratch_operands = 0 : i64, tpu.core_type = #tpu.core_type<tc>, window_params = [{transform_indices = @transform_0, window_bounds = array<i64: 8, 16>}, {transform_indices = @transform_1, window_bounds = array<i64: 8, 128>}, {pipeline_mode = #tpu.pipeline_mode<synchronous>, transform_indices = @transform_2, window_bounds = array<i64: 16, 128>}, {pipeline_mode = #tpu.pipeline_mode<synchronous>, transform_indices = @transform_3, window_bounds = array<i64: 128, 256>}, {pipeline_mode = #tpu.pipeline_mode<synchronous>, transform_indices = @transform_4, window_bounds = array<i64: 256, 512>}, {pipeline_mode = #tpu.pipeline_mode<synchronous>, transform_indices = @transform_5, window_bounds = array<i64: 512, 256>}, {pipeline_mode = #tpu.pipeline_mode<synchronous>, transform_indices = @transform_6, window_bounds = array<i64: 1, 1152>}, {pipeline_mode = #tpu.pipeline_mode<synchronous>, transform_indices = @transform_7, window_bounds = array<i64: 8, 128>}, {pipeline_mode = #tpu.pipeline_mode<synchronous>, transform_indices = @transform_8, window_bounds = array<i64: 49, 7>}, {pipeline_mode = #tpu.pipeline_mode<synchronous>, transform_indices = @transform_9, window_bounds = array<i64: 7, 49>}, {pipeline_mode = #tpu.pipeline_mode<synchronous>, transform_indices = @transform_10, window_bounds = array<i64: 7, 49>}, {pipeline_mode = #tpu.pipeline_mode<synchronous>, transform_indices = @transform_11, window_bounds = array<i64: 49, 245>}, {pipeline_mode = #tpu.pipeline_mode<synchronous>, transform_indices = @transform_12, window_bounds = array<i64: 35, 245>}, {pipeline_mode = #tpu.pipeline_mode<synchronous>, transform_indices = @transform_13, window_bounds = array<i64: 245, 35>}, {pipeline_mode = #tpu.pipeline_mode<synchronous>, transform_indices = @transform_14, window_bounds = array<i64: 5, 35, 7>}, {pipeline_mode = #tpu.pipeline_mode<synchronous>, transform_indices = @transform_15, window_bounds = array<i64: 7, 35>}, {pipeline_mode = #tpu.pipeline_mode<synchronous>, transform_indices = @transform_16, window_bounds = array<i64: 49, 128>}, {pipeline_mode = #tpu.pipeline_mode<synchronous>, transform_indices = @transform_17, window_bounds = array<i64: 35, 128>}, {transform_indices = @transform_18, window_bounds = array<i64: 8, 128>}]} {
    %c0 = arith.constant 0 : index
    %c0_0 = arith.constant 0 : index
    %0 = vector.load %arg7[%c0, %c0_0] : memref<1x1152xf32, #tpu.memory_space<vmem>>, vector<1x128xf32>
    %c0_1 = arith.constant 0 : index
    %c128 = arith.constant 128 : index
    %1 = vector.load %arg7[%c0_1, %c128] : memref<1x1152xf32, #tpu.memory_space<vmem>>, vector<1x256xf32>
    %c0_2 = arith.constant 0 : index
    %c384 = arith.constant 384 : index
    %2 = vector.load %arg7[%c0_2, %c384] : memref<1x1152xf32, #tpu.memory_space<vmem>>, vector<1x512xf32>
    %c0_3 = arith.constant 0 : index
    %c896 = arith.constant 896 : index
    %3 = vector.load %arg7[%c0_3, %c896] : memref<1x1152xf32, #tpu.memory_space<vmem>>, vector<1x256xf32>
    %c0_4 = arith.constant 0 : index
    %c0_5 = arith.constant 0 : index
    %4 = vector.load %arg8[%c0_4, %c0_5] : memref<8x128xf32, #tpu.memory_space<vmem>>, vector<1x49xf32>
    %c1 = arith.constant 1 : index
    %c0_6 = arith.constant 0 : index
    %5 = vector.load %arg8[%c1, %c0_6] : memref<8x128xf32, #tpu.memory_space<vmem>>, vector<1x49xf32>
    %c2 = arith.constant 2 : index
    %c0_7 = arith.constant 0 : index
    %6 = vector.load %arg8[%c2, %c0_7] : memref<8x128xf32, #tpu.memory_space<vmem>>, vector<1x35xf32>
    %c3 = arith.constant 3 : index
    %c0_8 = arith.constant 0 : index
    %7 = vector.load %arg8[%c3, %c0_8] : memref<8x128xf32, #tpu.memory_space<vmem>>, vector<1x35xf32>
    %c0_9 = arith.constant 0 : index
    %c0_10 = arith.constant 0 : index
    %8 = vector.load %arg2[%c0_9, %c0_10] : memref<8x128xf32, #tpu.memory_space<vmem>>, vector<8x49xf32>
    %c0_11 = arith.constant 0 : index
    %c64 = arith.constant 64 : index
    %9 = vector.load %arg2[%c0_11, %c64] : memref<8x128xf32, #tpu.memory_space<vmem>>, vector<8x35xf32>
    %c0_12 = arith.constant 0 : index
    %c0_13 = arith.constant 0 : index
    %10 = vector.load %arg1[%c0_12, %c0_13] : memref<8x16xf32, #tpu.memory_space<vmem>>, vector<8x16xf32>
    %11 = arith.truncf %10 : vector<8x16xf32> to vector<8x16xbf16>
    %c0_14 = arith.constant 0 : index
    %c0_15 = arith.constant 0 : index
    %12 = vector.load %arg3[%c0_14, %c0_15] : memref<16x128xbf16, #tpu.memory_space<vmem>>, vector<16x128xbf16>
    %cst = arith.constant dense<0.000000e+00> : vector<8x128xf32>
    %13 = tpu.matmul %11, %12, %cst {dimension_numbers = #tpu.dot_dimension_numbers<[1], [0], [0], [1], [0, 0, 1, 1], [], []>} : vector<8x16xbf16>, vector<16x128xbf16>, vector<8x128xf32> -> vector<8x128xf32>
    %14 = vector.broadcast %0 : vector<1x128xf32> to vector<8x128xf32>
    %15 = arith.addf %13, %14 : vector<8x128xf32>
    %16 = math.tanh %15 : vector<8x128xf32>
    %17 = arith.truncf %16 : vector<8x128xf32> to vector<8x128xbf16>
    %c0_16 = arith.constant 0 : index
    %c0_17 = arith.constant 0 : index
    %18 = vector.load %arg4[%c0_16, %c0_17] : memref<128x256xbf16, #tpu.memory_space<vmem>>, vector<128x256xbf16>
    %cst_18 = arith.constant dense<0.000000e+00> : vector<8x256xf32>
    %19 = tpu.matmul %17, %18, %cst_18 {dimension_numbers = #tpu.dot_dimension_numbers<[1], [0], [0], [1], [0, 0, 1, 1], [], []>} : vector<8x128xbf16>, vector<128x256xbf16>, vector<8x256xf32> -> vector<8x256xf32>
    %20 = vector.broadcast %1 : vector<1x256xf32> to vector<8x256xf32>
    %21 = arith.addf %19, %20 : vector<8x256xf32>
    %22 = math.tanh %21 : vector<8x256xf32>
    %23 = arith.truncf %22 : vector<8x256xf32> to vector<8x256xbf16>
    %c0_19 = arith.constant 0 : index
    %c0_20 = arith.constant 0 : index
    %24 = vector.load %arg5[%c0_19, %c0_20] : memref<256x512xbf16, #tpu.memory_space<vmem>>, vector<256x512xbf16>
    %cst_21 = arith.constant dense<0.000000e+00> : vector<8x512xf32>
    %25 = tpu.matmul %23, %24, %cst_21 {dimension_numbers = #tpu.dot_dimension_numbers<[1], [0], [0], [1], [0, 0, 1, 1], [], []>} : vector<8x256xbf16>, vector<256x512xbf16>, vector<8x512xf32> -> vector<8x512xf32>
    %26 = vector.broadcast %2 : vector<1x512xf32> to vector<8x512xf32>
    %27 = arith.addf %25, %26 : vector<8x512xf32>
    %28 = math.tanh %27 : vector<8x512xf32>
    %29 = arith.truncf %28 : vector<8x512xf32> to vector<8x512xbf16>
    %c0_22 = arith.constant 0 : index
    %c0_23 = arith.constant 0 : index
    %30 = vector.load %arg6[%c0_22, %c0_23] : memref<512x256xbf16, #tpu.memory_space<vmem>>, vector<512x256xbf16>
    %cst_24 = arith.constant dense<0.000000e+00> : vector<8x256xf32>
    %31 = tpu.matmul %29, %30, %cst_24 {dimension_numbers = #tpu.dot_dimension_numbers<[1], [0], [0], [1], [0, 0, 1, 1], [], []>} : vector<8x512xbf16>, vector<512x256xbf16>, vector<8x256xf32> -> vector<8x256xf32>
    %32 = vector.broadcast %3 : vector<1x256xf32> to vector<8x256xf32>
    %33 = arith.addf %31, %32 : vector<8x256xf32>
    %34 = vector.extract_strided_slice %33 {offsets = [0, 0], sizes = [8, 49], strides = [1, 1]} : vector<8x256xf32> to vector<8x49xf32>
    %35 = vector.extract_strided_slice %33 {offsets = [0, 128], sizes = [8, 35], strides = [1, 1]} : vector<8x256xf32> to vector<8x35xf32>
    %36 = arith.addf %34, %8 : vector<8x49xf32>
    %cst_25 = arith.constant 0.000000e+00 : f32
    %37 = vector.broadcast %cst_25 : f32 to vector<8x49xf32>
    %38 = arith.cmpf ogt, %36, %37 : vector<8x49xf32>
    %39 = arith.extui %38 : vector<8x49xi1> to vector<8x49xi32>
    %40 = arith.sitofp %39 : vector<8x49xi32> to vector<8x49xf32>
    %41 = vector.broadcast %4 : vector<1x49xf32> to vector<8x49xf32>
    %42 = arith.mulf %40, %41 : vector<8x49xf32>
    %43 = vector.broadcast %5 : vector<1x49xf32> to vector<8x49xf32>
    %44 = arith.addf %42, %43 : vector<8x49xf32>
    %c0_26 = arith.constant 0 : index
    %c0_27 = arith.constant 0 : index
    %45 = vector.load %arg9[%c0_26, %c0_27] : memref<49x7xf32, #tpu.memory_space<vmem>>, vector<49x7xf32>
    %cst_28 = arith.constant dense<0.000000e+00> : vector<8x7xf32>
    %46 = tpu.matmul %44, %45, %cst_28 {dimension_numbers = #tpu.dot_dimension_numbers<[1], [0], [0], [1], [0, 0, 1, 1], [], []>} : vector<8x49xf32>, vector<49x7xf32>, vector<8x7xf32> -> vector<8x7xf32>
    %47 = math.rsqrt %46 : vector<8x7xf32>
    %c0_29 = arith.constant 0 : index
    %c0_30 = arith.constant 0 : index
    %48 = vector.load %arg10[%c0_29, %c0_30] : memref<7x49xf32, #tpu.memory_space<vmem>>, vector<7x49xf32>
    %cst_31 = arith.constant dense<0.000000e+00> : vector<8x49xf32>
    %49 = tpu.matmul %47, %48, %cst_31 {dimension_numbers = #tpu.dot_dimension_numbers<[1], [0], [0], [1], [0, 0, 1, 1], [], []>} : vector<8x7xf32>, vector<7x49xf32>, vector<8x49xf32> -> vector<8x49xf32>
    %50 = arith.mulf %44, %49 : vector<8x49xf32>
    %c0_32 = arith.constant 0 : index
    %c0_33 = arith.constant 0 : index
    %51 = vector.load %arg11[%c0_32, %c0_33] : memref<7x49xf32, #tpu.memory_space<vmem>>, vector<7x49xf32>
    %cst_34 = arith.constant dense<0.000000e+00> : vector<8x49xf32>
    %52 = tpu.matmul %47, %51, %cst_34 {dimension_numbers = #tpu.dot_dimension_numbers<[1], [0], [0], [1], [0, 0, 1, 1], [], []>} : vector<8x7xf32>, vector<7x49xf32>, vector<8x49xf32> -> vector<8x49xf32>
    %53 = arith.mulf %50, %52 : vector<8x49xf32>
    %c0_35 = arith.constant 0 : index
    %c0_36 = arith.constant 0 : index
    %54 = vector.load %arg12[%c0_35, %c0_36] : memref<49x245xf32, #tpu.memory_space<vmem>>, vector<49x245xf32>
    %cst_37 = arith.constant dense<0.000000e+00> : vector<8x245xf32>
    %55 = tpu.matmul %53, %54, %cst_37 {dimension_numbers = #tpu.dot_dimension_numbers<[1], [0], [0], [1], [0, 0, 1, 1], [], []>} : vector<8x49xf32>, vector<49x245xf32>, vector<8x245xf32> -> vector<8x245xf32>
    %c0_38 = arith.constant 0 : index
    %c0_39 = arith.constant 0 : index
    %56 = vector.load %arg13[%c0_38, %c0_39] : memref<35x245xf32, #tpu.memory_space<vmem>>, vector<35x245xf32>
    %cst_40 = arith.constant dense<0.000000e+00> : vector<8x245xf32>
    %57 = tpu.matmul %35, %56, %cst_40 {dimension_numbers = #tpu.dot_dimension_numbers<[1], [0], [0], [1], [0, 0, 1, 1], [], []>} : vector<8x35xf32>, vector<35x245xf32>, vector<8x245xf32> -> vector<8x245xf32>
    %58 = arith.mulf %55, %57 : vector<8x245xf32>
    %c0_41 = arith.constant 0 : index
    %c0_42 = arith.constant 0 : index
    %59 = vector.load %arg14[%c0_41, %c0_42] : memref<245x35xf32, #tpu.memory_space<vmem>>, vector<245x35xf32>
    %cst_43 = arith.constant dense<0.000000e+00> : vector<8x35xf32>
    %60 = tpu.matmul %58, %59, %cst_43 {dimension_numbers = #tpu.dot_dimension_numbers<[1], [0], [0], [1], [0, 0, 1, 1], [], []>} : vector<8x245xf32>, vector<245x35xf32>, vector<8x35xf32> -> vector<8x35xf32>
    %61 = vector.broadcast %6 : vector<1x35xf32> to vector<8x35xf32>
    %62 = arith.addf %60, %61 : vector<8x35xf32>
    %63 = arith.addf %62, %9 : vector<8x35xf32>
    %cst_44 = arith.constant 1.000000e+00 : f32
    %64 = vector.broadcast %cst_44 : f32 to vector<8x35xf32>
    %65 = arith.divf %63, %64 : vector<8x35xf32>
    %c0_45 = arith.constant 0 : index
    %c0_46 = arith.constant 0 : index
    %c0_47 = arith.constant 0 : index
    %66 = vector.load %arg15[%c0_45, %c0_46, %c0_47] : memref<5x35x7xf32, #tpu.memory_space<vmem>>, vector<1x35x7xf32>
    %67 = vector.shape_cast %66 : vector<1x35x7xf32> to vector<35x7xf32>
    %cst_48 = arith.constant dense<0.000000e+00> : vector<8x7xf32>
    %68 = tpu.matmul %65, %67, %cst_48 {dimension_numbers = #tpu.dot_dimension_numbers<[1], [0], [0], [1], [0, 0, 1, 1], [], []>} : vector<8x35xf32>, vector<35x7xf32>, vector<8x7xf32> -> vector<8x7xf32>
    %cst_49 = arith.constant 0.000000e+00 : f32
    %69 = vector.broadcast %cst_49 : f32 to vector<8x7xf32>
    %c1_50 = arith.constant 1 : index
    %c0_51 = arith.constant 0 : index
    %c0_52 = arith.constant 0 : index
    %70 = vector.load %arg15[%c1_50, %c0_51, %c0_52] : memref<5x35x7xf32, #tpu.memory_space<vmem>>, vector<1x35x7xf32>
    %71 = vector.shape_cast %70 : vector<1x35x7xf32> to vector<35x7xf32>
    %cst_53 = arith.constant dense<0.000000e+00> : vector<8x7xf32>
    %72 = tpu.matmul %65, %71, %cst_53 {dimension_numbers = #tpu.dot_dimension_numbers<[1], [0], [0], [1], [0, 0, 1, 1], [], []>} : vector<8x35xf32>, vector<35x7xf32>, vector<8x7xf32> -> vector<8x7xf32>
    %73 = arith.cmpf ogt, %72, %68 : vector<8x7xf32>
    %74 = arith.select %73, %72, %68 : vector<8x7xi1>, vector<8x7xf32>
    %cst_54 = arith.constant 1.000000e+00 : f32
    %75 = vector.broadcast %cst_54 : f32 to vector<8x7xf32>
    %76 = arith.select %73, %75, %69 : vector<8x7xi1>, vector<8x7xf32>
    %c2_55 = arith.constant 2 : index
    %c0_56 = arith.constant 0 : index
    %c0_57 = arith.constant 0 : index
    %77 = vector.load %arg15[%c2_55, %c0_56, %c0_57] : memref<5x35x7xf32, #tpu.memory_space<vmem>>, vector<1x35x7xf32>
    %78 = vector.shape_cast %77 : vector<1x35x7xf32> to vector<35x7xf32>
    %cst_58 = arith.constant dense<0.000000e+00> : vector<8x7xf32>
    %79 = tpu.matmul %65, %78, %cst_58 {dimension_numbers = #tpu.dot_dimension_numbers<[1], [0], [0], [1], [0, 0, 1, 1], [], []>} : vector<8x35xf32>, vector<35x7xf32>, vector<8x7xf32> -> vector<8x7xf32>
    %80 = arith.cmpf ogt, %79, %74 : vector<8x7xf32>
    %81 = arith.select %80, %79, %74 : vector<8x7xi1>, vector<8x7xf32>
    %cst_59 = arith.constant 2.000000e+00 : f32
    %82 = vector.broadcast %cst_59 : f32 to vector<8x7xf32>
    %83 = arith.select %80, %82, %76 : vector<8x7xi1>, vector<8x7xf32>
    %c3_60 = arith.constant 3 : index
    %c0_61 = arith.constant 0 : index
    %c0_62 = arith.constant 0 : index
    %84 = vector.load %arg15[%c3_60, %c0_61, %c0_62] : memref<5x35x7xf32, #tpu.memory_space<vmem>>, vector<1x35x7xf32>
    %85 = vector.shape_cast %84 : vector<1x35x7xf32> to vector<35x7xf32>
    %cst_63 = arith.constant dense<0.000000e+00> : vector<8x7xf32>
    %86 = tpu.matmul %65, %85, %cst_63 {dimension_numbers = #tpu.dot_dimension_numbers<[1], [0], [0], [1], [0, 0, 1, 1], [], []>} : vector<8x35xf32>, vector<35x7xf32>, vector<8x7xf32> -> vector<8x7xf32>
    %87 = arith.cmpf ogt, %86, %81 : vector<8x7xf32>
    %88 = arith.select %87, %86, %81 : vector<8x7xi1>, vector<8x7xf32>
    %cst_64 = arith.constant 3.000000e+00 : f32
    %89 = vector.broadcast %cst_64 : f32 to vector<8x7xf32>
    %90 = arith.select %87, %89, %83 : vector<8x7xi1>, vector<8x7xf32>
    %c4 = arith.constant 4 : index
    %c0_65 = arith.constant 0 : index
    %c0_66 = arith.constant 0 : index
    %91 = vector.load %arg15[%c4, %c0_65, %c0_66] : memref<5x35x7xf32, #tpu.memory_space<vmem>>, vector<1x35x7xf32>
    %92 = vector.shape_cast %91 : vector<1x35x7xf32> to vector<35x7xf32>
    %cst_67 = arith.constant dense<0.000000e+00> : vector<8x7xf32>
    %93 = tpu.matmul %65, %92, %cst_67 {dimension_numbers = #tpu.dot_dimension_numbers<[1], [0], [0], [1], [0, 0, 1, 1], [], []>} : vector<8x35xf32>, vector<35x7xf32>, vector<8x7xf32> -> vector<8x7xf32>
    %94 = arith.cmpf ogt, %93, %88 : vector<8x7xf32>
    %cst_68 = arith.constant 4.000000e+00 : f32
    %95 = vector.broadcast %cst_68 : f32 to vector<8x7xf32>
    %96 = arith.select %94, %95, %90 : vector<8x7xi1>, vector<8x7xf32>
    %c0_69 = arith.constant 0 : index
    %c0_70 = arith.constant 0 : index
    %97 = vector.load %arg16[%c0_69, %c0_70] : memref<7x35xf32, #tpu.memory_space<vmem>>, vector<7x35xf32>
    %cst_71 = arith.constant dense<0.000000e+00> : vector<8x35xf32>
    %98 = tpu.matmul %96, %97, %cst_71 {dimension_numbers = #tpu.dot_dimension_numbers<[1], [0], [0], [1], [0, 0, 1, 1], [], []>} : vector<8x7xf32>, vector<7x35xf32>, vector<8x35xf32> -> vector<8x35xf32>
    %99 = vector.broadcast %7 : vector<1x35xf32> to vector<8x35xf32>
    %100 = arith.cmpf oeq, %98, %99 : vector<8x35xf32>
    %101 = arith.extui %100 : vector<8x35xi1> to vector<8x35xi32>
    %102 = arith.sitofp %101 : vector<8x35xi32> to vector<8x35xf32>
    %c0_72 = arith.constant 0 : index
    %c0_73 = arith.constant 0 : index
    %103 = vector.load %arg17[%c0_72, %c0_73] : memref<49x128xf32, #tpu.memory_space<vmem>>, vector<49x128xf32>
    %cst_74 = arith.constant dense<0.000000e+00> : vector<8x128xf32>
    %104 = tpu.matmul %42, %103, %cst_74 {dimension_numbers = #tpu.dot_dimension_numbers<[1], [0], [0], [1], [0, 0, 1, 1], [], []>} : vector<8x49xf32>, vector<49x128xf32>, vector<8x128xf32> -> vector<8x128xf32>
    %c0_75 = arith.constant 0 : index
    %c0_76 = arith.constant 0 : index
    %105 = vector.load %arg18[%c0_75, %c0_76] : memref<35x128xf32, #tpu.memory_space<vmem>>, vector<35x128xf32>
    %cst_77 = arith.constant dense<0.000000e+00> : vector<8x128xf32>
    %106 = tpu.matmul %102, %105, %cst_77 {dimension_numbers = #tpu.dot_dimension_numbers<[1], [0], [0], [1], [0, 0, 1, 1], [], []>} : vector<8x35xf32>, vector<35x128xf32>, vector<8x128xf32> -> vector<8x128xf32>
    %107 = arith.addf %104, %106 : vector<8x128xf32>
    %c0_78 = arith.constant 0 : index
    %c0_79 = arith.constant 0 : index
    %108 = vector.load %arg19[%c0_78, %c0_79] : memref<8x128xf32, #tpu.memory_space<vmem>>, vector<8x128xf32>
    tpu.vector_store %arg19[%c0_78, %c0_79], %107 {strides = array<i32>} : memref<8x128xf32, #tpu.memory_space<vmem>>, vector<8x128xf32>,
    return
  }
  func.func @transform_0(%arg0: i32) -> (i32, i32) {
    %c0_i32 = arith.constant 0 : i32
    %c0_i32_0 = arith.constant 0 : i32
    return %arg0, %c0_i32 : i32, i32
  }
  func.func @transform_1(%arg0: i32) -> (i32, i32) {
    %c0_i32 = arith.constant 0 : i32
    %c0_i32_0 = arith.constant 0 : i32
    return %arg0, %c0_i32 : i32, i32
  }
  func.func @transform_2(%arg0: i32) -> (i32, i32) {
    %c0_i32 = arith.constant 0 : i32
    %c0_i32_0 = arith.constant 0 : i32
    %c0_i32_1 = arith.constant 0 : i32
    return %c0_i32, %c0_i32_0 : i32, i32
  }
  func.func @transform_3(%arg0: i32) -> (i32, i32) {
    %c0_i32 = arith.constant 0 : i32
    %c0_i32_0 = arith.constant 0 : i32
    %c0_i32_1 = arith.constant 0 : i32
    return %c0_i32, %c0_i32_0 : i32, i32
  }
  func.func @transform_4(%arg0: i32) -> (i32, i32) {
    %c0_i32 = arith.constant 0 : i32
    %c0_i32_0 = arith.constant 0 : i32
    %c0_i32_1 = arith.constant 0 : i32
    return %c0_i32, %c0_i32_0 : i32, i32
  }
  func.func @transform_5(%arg0: i32) -> (i32, i32) {
    %c0_i32 = arith.constant 0 : i32
    %c0_i32_0 = arith.constant 0 : i32
    %c0_i32_1 = arith.constant 0 : i32
    return %c0_i32, %c0_i32_0 : i32, i32
  }
  func.func @transform_6(%arg0: i32) -> (i32, i32) {
    %c0_i32 = arith.constant 0 : i32
    %c0_i32_0 = arith.constant 0 : i32
    %c0_i32_1 = arith.constant 0 : i32
    return %c0_i32, %c0_i32_0 : i32, i32
  }
  func.func @transform_7(%arg0: i32) -> (i32, i32) {
    %c0_i32 = arith.constant 0 : i32
    %c0_i32_0 = arith.constant 0 : i32
    %c0_i32_1 = arith.constant 0 : i32
    return %c0_i32, %c0_i32_0 : i32, i32
  }
  func.func @transform_8(%arg0: i32) -> (i32, i32) {
    %c0_i32 = arith.constant 0 : i32
    %c0_i32_0 = arith.constant 0 : i32
    %c0_i32_1 = arith.constant 0 : i32
    return %c0_i32, %c0_i32_0 : i32, i32
  }
  func.func @transform_9(%arg0: i32) -> (i32, i32) {
    %c0_i32 = arith.constant 0 : i32
    %c0_i32_0 = arith.constant 0 : i32
    %c0_i32_1 = arith.constant 0 : i32
    return %c0_i32, %c0_i32_0 : i32, i32
  }
  func.func @transform_10(%arg0: i32) -> (i32, i32) {
    %c0_i32 = arith.constant 0 : i32
    %c0_i32_0 = arith.constant 0 : i32
    %c0_i32_1 = arith.constant 0 : i32
    return %c0_i32, %c0_i32_0 : i32, i32
  }
  func.func @transform_11(%arg0: i32) -> (i32, i32) {
    %c0_i32 = arith.constant 0 : i32
    %c0_i32_0 = arith.constant 0 : i32
    %c0_i32_1 = arith.constant 0 : i32
    return %c0_i32, %c0_i32_0 : i32, i32
  }
  func.func @transform_12(%arg0: i32) -> (i32, i32) {
    %c0_i32 = arith.constant 0 : i32
    %c0_i32_0 = arith.constant 0 : i32
    %c0_i32_1 = arith.constant 0 : i32
    return %c0_i32, %c0_i32_0 : i32, i32
  }
  func.func @transform_13(%arg0: i32) -> (i32, i32) {
    %c0_i32 = arith.constant 0 : i32
    %c0_i32_0 = arith.constant 0 : i32
    %c0_i32_1 = arith.constant 0 : i32
    return %c0_i32, %c0_i32_0 : i32, i32
  }
  func.func @transform_14(%arg0: i32) -> (i32, i32, i32) {
    %c0_i32 = arith.constant 0 : i32
    %c0_i32_0 = arith.constant 0 : i32
    %c0_i32_1 = arith.constant 0 : i32
    %c0_i32_2 = arith.constant 0 : i32
    return %c0_i32, %c0_i32_0, %c0_i32_1 : i32, i32, i32
  }
  func.func @transform_15(%arg0: i32) -> (i32, i32) {
    %c0_i32 = arith.constant 0 : i32
    %c0_i32_0 = arith.constant 0 : i32
    %c0_i32_1 = arith.constant 0 : i32
    return %c0_i32, %c0_i32_0 : i32, i32
  }
  func.func @transform_16(%arg0: i32) -> (i32, i32) {
    %c0_i32 = arith.constant 0 : i32
    %c0_i32_0 = arith.constant 0 : i32
    %c0_i32_1 = arith.constant 0 : i32
    return %c0_i32, %c0_i32_0 : i32, i32
  }
  func.func @transform_17(%arg0: i32) -> (i32, i32) {
    %c0_i32 = arith.constant 0 : i32
    %c0_i32_0 = arith.constant 0 : i32
    %c0_i32_1 = arith.constant 0 : i32
    return %c0_i32, %c0_i32_0 : i32, i32
  }
  func.func @transform_18(%arg0: i32) -> (i32, i32) {
    %c0_i32 = arith.constant 0 : i32
    %c0_i32_0 = arith.constant 0 : i32
    return %arg0, %c0_i32 : i32, i32
  }
}

</mosaic_0001>

<bundles_post_ra>
// kernel: tpu_custom_call.1
= control target key start
LH: loop header
LB: loop body
LE: loop exit
PB: predicated region body
PF: predicated region fallthrough
CT: control target
= control target key end

     0   :  { %s3346_s0 = inlined_call_operand.vmem [shape: f32[8,16], index: 0, kind: input, shape index: {}]   ;;  %s3347_s1 = inlined_call_operand.vmem [shape: f32[8,128], index: 1, kind: input, shape index: {}]   ;;  %s3348_s2 = inlined_call_operand.vmem [shape: bf16[16,128], index: 2, kind: input, shape index: {}]   ;;  %s3349_s3 = inlined_call_operand.vmem [shape: bf16[128,256], index: 3, kind: input, shape index: {}]   ;;  %s3350_s4 = inlined_call_operand.hbm [shape: bf16[256,512], index: 4, kind: input, shape index: {}]   ;;  %s3351_s5 = inlined_call_operand.hbm [shape: bf16[512,256], index: 5, kind: input, shape index: {}]   ;;  %s3352_s6 = inlined_call_operand.vmem [shape: f32[1,1152], index: 6, kind: input, shape index: {}]   ;;  %s3353_s7 = inlined_call_operand.vmem [shape: f32[8,128], index: 7, kind: input, shape index: {}]   ;;  %s3354_s8 = inlined_call_operand.vmem [shape: f32[49,7], index: 8, kind: input, shape index: {}]   ;;  %s3355_s9 = inlined_call_operand.vmem [shape: f32[7,49], index: 9, kind: input, shape index: {}]   ;;  %s3356_s10 = inlined_call_operand.vmem [shape: f32[7,49], index: 10, kind: input, shape index: {}]   ;;  %s3357_s11 = inlined_call_operand.vmem [shape: f32[49,245], index: 11, kind: input, shape index: {}]   ;;  %s3358_s12 = inlined_call_operand.vmem [shape: f32[35,245], index: 12, kind: input, shape index: {}]   ;;  %s3359_s13 = inlined_call_operand.vmem [shape: f32[245,35], index: 13, kind: input, shape index: {}]   ;;  %s3360_s14 = inlined_call_operand.vmem [shape: f32[5,35,7], index: 14, kind: input, shape index: {}]   ;;  %s3361_s15 = inlined_call_operand.vmem [shape: f32[7,35], index: 15, kind: input, shape index: {}]   ;;  %s3362_s16 = inlined_call_operand.vmem [shape: f32[49,128], index: 16, kind: input, shape index: {}]   ;;  %s3363_s17 = inlined_call_operand.vmem [shape: f32[35,128], index: 17, kind: input, shape index: {}]   ;;  %s3364_s18 = inlined_call_operand.hbm [shape: f32[8,128], index: 18, kind: output, shape index: {}]  }
   0x1   :  { %3365 = sst [smem:[#allocation11_spill]] %s3346_s0 }
   0x2   :  { %3366 = sst [smem:[#allocation12_spill]] %s3347_s1 }
   0x3   :  { %3367 = sst [smem:[#allocation13_spill]] %s3348_s2 }
   0x4   :  { %23 = vsyncpa [#allocation3], 0 }
   0x5   :  { %24 = vsyncpa [#allocation6], 0 }
   0x6   :  { %25 = vsyncpa [#allocation4], 0  ;;  %s38_s29 = sshll.u32 %s3350_s4, 4  ;;  %s2742_s30 = smov [#allocation2]   ;;  %s39_s29 = int_to_ptr.hbm [resolvable:$true] %s38_s29 }
   0x7   :  { %s40_s0 = sshll.u32 %s2742_s30, 4  ;;  %s51_s20 = sshll.u32 %s3351_s5, 4  ;;  %s41_s0 = int_to_ptr.vmem [resolvable:$true] %s40_s0  ;;  %s52_s20 = int_to_ptr.hbm [resolvable:$true] %s51_s20 }
   0x8   :  { %s2743_s21 = smov 256   ;;  %s2744_s22 = smov 16  }
   0x9   :  { %46 = dma.hbm_to_vmem [thread:$0]  %s39_s29, 8192, %s41_s0, [#allocation3], %s2743_s21, %s2743_s21, %s2744_s22  }
   0xa   :  { %s2745_s2 = smov [#allocation5]   ;;  %s2746_s24 = smov 128  }
   0xb   :  { %s53_s23 = sshll.u32 %s2745_s2, 4  ;;  %s2747_s25 = smov 8   ;;  %s54_s23 = int_to_ptr.vmem [resolvable:$true] %s53_s23 }
   0xc   :  { %59 = dma.hbm_to_vmem [thread:$0]  %s52_s20, 8192, %s54_s23, [#allocation6], %s2746_s24, %s2746_s24, %s2747_s25  }
   0xd   :  { %2736 = dma.done.wait [#allocation3], 8192  }
   0xe   :  { %2737 = vsyncadd [#allocation3], 4294959104 }
   0xf   :  { %2738 = dma.done.wait [#allocation6], 8192  }
  0x10   :  { %2739 = vsyncadd [#allocation6], 4294959104  ;;  %s3368_s27 = sld [smem:[#allocation13_spill]]  ;;  %vm115_vm0 = vcmask 130048   ;;  %v1917_v2 = vld [vmem:[%s3349_s3 + $0x70] sm:$0xf] }
  0x11   :  { %s3369_s30 = sld [smem:[#allocation11_spill]]  ;;  %v2505_v4 = vld [vmem:[%s3349_s3 + $0x74] sm:$0xf0]  ;;  %v2504_v5 = vld [vmem:[%s3349_s3 + $0x74] sm:$0xf]  ;;  %vm1282_vm1 = vcmask 1040384  }
  0x12   :  { %v1919_v6 = vld [vmem:[%s3349_s3 + $0x78] sm:$0xf0]  ;;  %v1918_v7 = vor.u32 %v2505_v4, %v1917_v2  ;;  %v1909_v9 = vld [vmem:[%s3349_s3 + $0x60] sm:$0xf]  ;;  %v2503_v10 = vld [vmem:[%s3349_s3 + $0x64] sm:$0xf0] }
  0x13   :  { %v1922_v8 = vor.u32 %v2504_v5, %v1919_v6  ;;  %v2502_v11 = vld [vmem:[%s3349_s3 + $0x64] sm:$0xf]  ;;  %v1911_v12 = vld [vmem:[%s3349_s3 + $0x68] sm:$0xf0]  ;;  %v1910_v13 = vor.u32 %v2503_v10, %v1909_v9  ;;  %v1901_v15 = vld [vmem:[%s3349_s3 + $0x50] sm:$0xf] }
  0x14   :  { %235 = vmatpush.bf16.msra.mxu1 %v1918_v7  ;;  %v1914_v14 = vor.u32 %v2502_v11, %v1911_v12  ;;  %v2501_v16 = vld [vmem:[%s3349_s3 + $0x54] sm:$0xf0]  ;;  %v2500_v17 = vld [vmem:[%s3349_s3 + $0x54] sm:$0xf]  ;;  %v1903_v18 = vld [vmem:[%s3349_s3 + $0x58] sm:$0xf0] }
  0x15   :  { %248 = vmatpush.bf16.msra.mxu2 %v1922_v8  ;;  %v1893_v19 = vld [vmem:[%s3349_s3 + $0x40] sm:$0xf]  ;;  %v2499_v20 = vld [vmem:[%s3349_s3 + $0x44] sm:$0xf0]  ;;  %v1902_v21 = vor.u32 %v2501_v16, %v1901_v15  ;;  %v1906_v22 = vor.u32 %v2500_v17, %v1903_v18  ;;  %v2498_v23 = vld [vmem:[%s3349_s3 + $0x44] sm:$0xf] }
  0x16   :  { %v2489_v0 = vld [vmem:[%s3368_s27] sm:$0xff]  ;;  %v1895_v24 = vld [vmem:[%s3349_s3 + $0x48] sm:$0xf0]  ;;  %v1894_v25 = vor.u32 %v2499_v20, %v1893_v19  ;;  %v1885_v27 = vld [vmem:[%s3349_s3 + $0x30] sm:$0xf]  ;;  %vm1448_vm2 = vcmask 1042432  }
  0x17   :  { %v102_v1 = vld [vmem:[%s3369_s30] sm:$0xff]  ;;  %126 = vmatpush.bf16.msra.mxu0 %v2489_v0  ;;  %v1898_v26 = vor.u32 %v2498_v23, %v1895_v24  ;;  %v2497_v28 = vld [vmem:[%s3349_s3 + $0x34] sm:$0xf0]  ;;  %v2496_v29 = vld [vmem:[%s3349_s3 + $0x34] sm:$0xf]  ;;  %s3370_s25 = sld [smem:[#allocation12_spill]] }
  0x18   :  { %v103_v3 = vpack.c.bf16 %v102_v1, %v102_v1  ;;  %236 = vmatpush.bf16.msra.mxu1 %v1910_v13  ;;  %v1887_v30 = vld [vmem:[%s3349_s3 + $0x38] sm:$0xf0]  ;;  %v1886_v31 = vor.u32 %v2497_v28, %v1885_v27  ;;  %v1877_v33 = vld [vmem:[%s3349_s3 + $0x20] sm:$0xf]  ;;  %v2495_v34 = vld [vmem:[%s3349_s3 + $0x24] sm:$0xf0] }
  0x19   :  { %249 = vmatpush.bf16.msra.mxu2 %v1914_v14  ;;  %v1890_v32 = vor.u32 %v2496_v29, %v1887_v30  ;;  %v2494_v35 = vld [vmem:[%s3349_s3 + $0x24] sm:$0xf]  ;;  %v1878_v36 = vor.u32 %v2495_v34, %v1877_v33  ;;  %v1879_v37 = vld [vmem:[%s3349_s3 + $0x28] sm:$0xf0]  ;;  %v1869_v39 = vld [vmem:[%s3349_s3 + $0x10] sm:$0xf] }
  0x1a   :  { %1858 = vmatmul.msk.bf16.vlgmr.msra.gmra.mxu0 %vm115_vm0, %v103_v3  ;;  %v1882_v38 = vor.u32 %v2494_v35, %v1879_v37  ;;  %v2493_v40 = vld [vmem:[%s3349_s3 + $0x14] sm:$0xf0]  ;;  %v2492_v41 = vld [vmem:[%s3349_s3 + $0x14] sm:$0xf]  ;;  %v1871_v43 = vld [vmem:[%s3349_s3 + $0x18] sm:$0xf0] }
  0x1b   :  { %v1870_v42 = vor.u32 %v2493_v40, %v1869_v39  ;;  %v1874_v44 = vor.u32 %v2492_v41, %v1871_v43  ;;  %v1861_v45 = vld [vmem:[%s3349_s3] sm:$0xf]  ;;  %v2491_v46 = vld [vmem:[%s3349_s3 + $0x4] sm:$0xf0]  ;;  %v2490_v47 = vld [vmem:[%s3349_s3 + $0x4] sm:$0xf] }
  0x1c   :  { %237 = vmatpush.bf16.msra.mxu1 %v1902_v21  ;;  %v1862_v48 = vor.u32 %v2491_v46, %v1861_v45  ;;  %v1863_v49 = vld [vmem:[%s3349_s3 + $0x8] sm:$0xf0]  ;;  %v2037_v51 = vld [vmem:[#allocation2 + $0xe0] sm:$0xf]  ;;  %v2536_v52 = vld [vmem:[#allocation2 + $0xec] sm:$0xf0] }
  0x1d   :  { %250 = vmatpush.bf16.msra.mxu2 %v1906_v22  ;;  %v1866_v50 = vor.u32 %v2490_v47, %v1863_v49  ;;  %v2534_v53 = vld [vmem:[#allocation2 + $0xe4] sm:$0xf]  ;;  %v2038_v54 = vor.u32 %v2536_v52, %v2037_v51  ;;  %v2039_v55 = vld [vmem:[#allocation2 + $0xf0] sm:$0xf0]  ;;  %v2021_v56 = vld [vmem:[#allocation2 + $0xc0] sm:$0xf] }
  0x1e   :  { %v2532_v57 = vld [vmem:[#allocation2 + $0xcc] sm:$0xf0]  ;;  %v2042_v58 = vor.u32 %v2534_v53, %v2039_v55  ;;  %v2530_v59 = vld [vmem:[#allocation2 + $0xc4] sm:$0xf]  ;;  %v2023_v60 = vld [vmem:[#allocation2 + $0xd0] sm:$0xf0] }
  0x1f   :  { %v2165_v61 = vld [vmem:[#allocation2 + $0x1e0] sm:$0xf]  ;;  %658 = vmatpush.bf16.msra.mxu3 %v2038_v54  ;;  %v2022_v62 = vor.u32 %v2532_v57, %v2021_v56  ;;  %v2568_v63 = vld [vmem:[#allocation2 + $0x1ec] sm:$0xf0]  ;;  %v2566_v0 = vld [vmem:[#allocation2 + $0x1e4] sm:$0xf]  ;;  %v2026_v2 = vor.u32 %v2530_v59, %v2023_v60 }
  0x20   :  { %238 = vmatpush.bf16.msra.mxu1 %v1894_v25  ;;  %v2167_v1 = vld [vmem:[#allocation2 + $0x1f0] sm:$0xf0]  ;;  %v2166_v3 = vor.u32 %v2568_v63, %v2165_v61  ;;  %v2005_v5 = vld [vmem:[#allocation2 + $0xa0] sm:$0xf]  ;;  %v2528_v6 = vld [vmem:[#allocation2 + $0xac] sm:$0xf0] }
  0x21   :  { %251 = vmatpush.bf16.msra.mxu2 %v1898_v26  ;;  %v2170_v4 = vor.u32 %v2566_v0, %v2167_v1  ;;  %v2526_v7 = vld [vmem:[#allocation2 + $0xa4] sm:$0xf]  ;;  %v2007_v8 = vld [vmem:[#allocation2 + $0xb0] sm:$0xf0]  ;;  %v2149_v9 = vld [vmem:[#allocation2 + $0x1c0] sm:$0xf]  ;;  %v2006_v14 = vor.u32 %v2528_v6, %v2005_v5 }
  0x22   :  { %v2564_v10 = vld [vmem:[#allocation2 + $0x1cc] sm:$0xf0]  ;;  %671 = vmatpush.bf16.msrb.mxu0 %v2166_v3  ;;  %v2562_v12 = vld [vmem:[#allocation2 + $0x1c4] sm:$0xf]  ;;  %v2151_v13 = vld [vmem:[#allocation2 + $0x1d0] sm:$0xf0]  ;;  %v2010_v18 = vor.u32 %v2526_v7, %v2007_v8 }
  0x23   :  { %v2150_v11 = vor.u32 %v2564_v10, %v2149_v9  ;;  %659 = vmatpush.bf16.msra.mxu3 %v2022_v62  ;;  %v2154_v15 = vor.u32 %v2562_v12, %v2151_v13  ;;  %v1989_v16 = vld [vmem:[#allocation2 + $0x80] sm:$0xf]  ;;  %v2524_v17 = vld [vmem:[#allocation2 + $0x8c] sm:$0xf0]  ;;  %v2558_v21 = vld [vmem:[#allocation2 + $0x1a4] sm:$0xf] }
  0x24   :  { %239 = vmatpush.bf16.msra.mxu1 %v1886_v31  ;;  %v2133_v19 = vld [vmem:[#allocation2 + $0x1a0] sm:$0xf]  ;;  %v2560_v20 = vld [vmem:[#allocation2 + $0x1ac] sm:$0xf0]  ;;  %v2522_v22 = vld [vmem:[#allocation2 + $0x84] sm:$0xf]  ;;  %v1990_v28 = vor.u32 %v2524_v17, %v1989_v16 }
  0x25   :  { %252 = vmatpush.bf16.msra.mxu2 %v1890_v32  ;;  %v1991_v23 = vld [vmem:[#allocation2 + $0x90] sm:$0xf0]  ;;  %v2134_v25 = vor.u32 %v2560_v20, %v2133_v19  ;;  %v2117_v27 = vld [vmem:[#allocation2 + $0x180] sm:$0xf]  ;;  %v2556_v29 = vld [vmem:[#allocation2 + $0x18c] sm:$0xf0] }
  0x26   :  { %v2135_v24 = vld [vmem:[#allocation2 + $0x1b0] sm:$0xf0]  ;;  %672 = vmatpush.bf16.msrb.mxu0 %v2150_v11  ;;  %v2554_v30 = vld [vmem:[#allocation2 + $0x184] sm:$0xf]  ;;  %v1994_v32 = vor.u32 %v2522_v22, %v1991_v23  ;;  %v1973_v33 = vld [vmem:[#allocation2 + $0x60] sm:$0xf]  ;;  %v2118_v37 = vor.u32 %v2556_v29, %v2117_v27 }
  0x27   :  { %v2138_v26 = vor.u32 %v2558_v21, %v2135_v24  ;;  %660 = vmatpush.bf16.msra.mxu3 %v2006_v14  ;;  %v2119_v31 = vld [vmem:[#allocation2 + $0x190] sm:$0xf0]  ;;  %v2520_v34 = vld [vmem:[#allocation2 + $0x6c] sm:$0xf0]  ;;  %v2518_v35 = vld [vmem:[#allocation2 + $0x64] sm:$0xf] }
  0x28   :  { %240 = vmatpush.bf16.msra.mxu1 %v1878_v36  ;;  %v1975_v36 = vld [vmem:[#allocation2 + $0x70] sm:$0xf0]  ;;  %v2101_v39 = vld [vmem:[#allocation2 + $0x160] sm:$0xf]  ;;  %v1974_v40 = vor.u32 %v2520_v34, %v1973_v33  ;;  %v2552_v41 = vld [vmem:[#allocation2 + $0x16c] sm:$0xf0] }
  0x29   :  { %253 = vmatpush.bf16.msra.mxu2 %v1882_v38  ;;  %v2122_v38 = vor.u32 %v2554_v30, %v2119_v31  ;;  %v2103_v43 = vld [vmem:[#allocation2 + $0x170] sm:$0xf0]  ;;  %v1957_v45 = vld [vmem:[#allocation2 + $0x40] sm:$0xf]  ;;  %v2516_v46 = vld [vmem:[#allocation2 + $0x4c] sm:$0xf0] }
  0x2a   :  { %673 = vmatpush.bf16.msrb.mxu0 %v2134_v25  ;;  %v2643_v47 = vld [vmem:[%s3352_s6] ss:$0 sm:$0xff]  ;;  %v1959_v49 = vld [vmem:[#allocation2 + $0x50] sm:$0xf0]  ;;  %v1958_v53 = vor.u32 %v2516_v46, %v1957_v45  ;;  %v2548_v54 = vld [vmem:[#allocation2 + $0x14c] sm:$0xf0] }
  0x2b   :  { %661 = vmatpush.bf16.msra.mxu3 %v1990_v28  ;;  %v2085_v52 = vld [vmem:[#allocation2 + $0x140] sm:$0xf]  ;;  %v2546_v55 = vld [vmem:[#allocation2 + $0x144] sm:$0xf]  ;;  %v2087_v56 = vld [vmem:[#allocation2 + $0x150] sm:$0xf0] }
  0x2c   :  { %241 = vmatpush.bf16.msra.mxu1 %v1870_v42  ;;  %v2550_v42 = vld [vmem:[#allocation2 + $0x164] sm:$0xf]  ;;  %v1941_v59 = vld [vmem:[#allocation2 + $0x20] sm:$0xf]  ;;  %v2512_v60 = vld [vmem:[#allocation2 + $0x2c] sm:$0xf0]  ;;  %v2086_v0 = vor.u32 %v2548_v54, %v2085_v52  ;;  %v2090_v1 = vor.u32 %v2546_v55, %v2087_v56 }
  0x2d   :  { %254 = vmatpush.bf16.msra.mxu2 %v1874_v44  ;;  %v1978_v44 = vor.u32 %v2518_v35, %v1975_v36  ;;  %v2106_v51 = vor.u32 %v2550_v42, %v2103_v43  ;;  %v2510_v62 = vld [vmem:[#allocation2 + $0x24] sm:$0xf]  ;;  %v1943_v63 = vld [vmem:[#allocation2 + $0x30] sm:$0xf0]  ;;  %v1942_v3 = vor.u32 %v2512_v60, %v1941_v59  ;;  %v1925_v8 = vld [vmem:[#allocation2] sm:$0xf] }
  0x2e   :  { %674 = vmatpush.bf16.msrb.mxu0 %v2118_v37  ;;  %v2542_v5 = vld [vmem:[#allocation2 + $0x124] sm:$0xf]  ;;  %v2071_v6 = vld [vmem:[#allocation2 + $0x130] sm:$0xf0]  ;;  %v1946_v7 = vor.u32 %v2510_v62, %v1943_v63  ;;  %v2508_v9 = vld [vmem:[#allocation2 + $0xc] sm:$0xf0] }
  0x2f   :  { %662 = vmatpush.bf16.msra.mxu3 %v1974_v40  ;;  %v2506_v10 = vld [vmem:[#allocation2 + $0x4] sm:$0xf]  ;;  %v1927_v11 = vld [vmem:[#allocation2 + $0x10] sm:$0xf0]  ;;  %v2045_v12 = vld [vmem:[#allocation2 + $0xe8] sm:$0xf]  ;;  %v1926_v16 = vor.u32 %v2508_v9, %v1925_v8 }
  0x30   :  { %242 = vmatpush.bf16.msra.mxu1 %v1862_v48  ;;  %v2514_v48 = vld [vmem:[#allocation2 + $0x44] sm:$0xf]  ;;  %v2537_v13 = vld [vmem:[#allocation2 + $0xf4] sm:$0xf0]  ;;  %v2535_v17 = vld [vmem:[#allocation2 + $0xec] sm:$0xf]  ;;  %v1930_v21 = vor.u32 %v2506_v10, %v1927_v11 }
  0x31   :  { %255 = vmatpush.bf16.msra.mxu2 %v1866_v50  ;;  %v2102_v50 = vor.u32 %v2552_v41, %v2101_v39  ;;  %v2046_v22 = vor.u32 %v2537_v13, %v2045_v12  ;;  %v2029_v25 = vld [vmem:[#allocation2 + $0xc8] sm:$0xf]  ;;  %v2531_v27 = vld [vmem:[#allocation2 + $0xcc] sm:$0xf]  ;;  %v2031_v29 = vld [vmem:[#allocation2 + $0xd8] sm:$0xf0] }
  0x32   :  { %v2053_v30 = vld [vmem:[#allocation2 + $0x100] sm:$0xf]  ;;  %v2540_v31 = vld [vmem:[#allocation2 + $0x10c] sm:$0xf0]  ;;  %v2538_v34 = vld [vmem:[#allocation2 + $0x104] sm:$0xf] }
  0x33   :  { %675 = vmatpush.bf16.msrb.mxu0 %v2102_v50  ;;  %663 = vmatpush.bf16.msra.mxu3 %v1958_v53  ;;  %v2054_v33 = vor.u32 %v2540_v31, %v2053_v30  ;;  %v2055_v35 = vld [vmem:[#allocation2 + $0x110] sm:$0xf0]  ;;  %v2173_v36 = vld [vmem:[#allocation2 + $0x1e8] sm:$0xf]  ;;  %v2567_v39 = vld [vmem:[#allocation2 + $0x1ec] sm:$0xf] }
  0x34   :  { %684 = vmatpush.bf16.msrb.mxu1 %v2042_v58  ;;  %v1962_v58 = vor.u32 %v2514_v48, %v1959_v49  ;;  %v2058_v37 = vor.u32 %v2538_v34, %v2055_v35  ;;  %v2175_v40 = vld [vmem:[#allocation2 + $0x1f8] sm:$0xf0]  ;;  %v2013_v43 = vld [vmem:[#allocation2 + $0xa8] sm:$0xf]  ;;  %v2527_v45 = vld [vmem:[#allocation2 + $0xac] sm:$0xf] }
  0x35   :  { %697 = vmatpush.bf16.msrb.mxu2 %v2170_v4  ;;  %v2544_v4 = vld [vmem:[#allocation2 + $0x12c] sm:$0xf0]  ;;  %v2178_v42 = vor.u32 %v2567_v39, %v2175_v40  ;;  %v2157_v49 = vld [vmem:[#allocation2 + $0x1c8] sm:$0xf]  ;;  %v2565_v50 = vld [vmem:[#allocation2 + $0x1d4] sm:$0xf0] }
  0x36   :  { %v2158_v52 = vor.u32 %v2565_v50, %v2157_v49  ;;  %v2159_v53 = vld [vmem:[#allocation2 + $0x1d8] sm:$0xf0]  ;;  %v1997_v55 = vld [vmem:[#allocation2 + $0x88] sm:$0xf]  ;;  %v2525_v56 = vld [vmem:[#allocation2 + $0x94] sm:$0xf0] }
  0x37   :  { %676 = vmatpush.bf16.msrb.mxu0 %v2086_v0  ;;  %664 = vmatpush.bf16.msra.mxu3 %v1942_v3  ;;  %v1999_v59 = vld [vmem:[#allocation2 + $0x98] sm:$0xf0]  ;;  %v2561_v62 = vld [vmem:[#allocation2 + $0x1b4] sm:$0xf0]  ;;  %v2559_v63 = vld [vmem:[#allocation2 + $0x1ac] sm:$0xf] }
  0x38   :  { %685 = vmatpush.bf16.msrb.mxu1 %v2026_v2  ;;  %v2069_v2 = vld [vmem:[#allocation2 + $0x120] sm:$0xf]  ;;  %v1981_v3 = vld [vmem:[#allocation2 + $0x68] sm:$0xf]  ;;  %v2557_v10 = vld [vmem:[#allocation2 + $0x194] sm:$0xf0] }
  0x39   :  { %698 = vmatpush.bf16.msrb.mxu2 %v2154_v15  ;;  %v2070_v14 = vor.u32 %v2544_v4, %v2069_v2  ;;  %v2074_v15 = vor.u32 %v2542_v5, %v2071_v6  ;;  %v2521_v4 = vld [vmem:[#allocation2 + $0x74] sm:$0xf0]  ;;  %v2519_v5 = vld [vmem:[#allocation2 + $0x6c] sm:$0xf]  ;;  %v2125_v9 = vld [vmem:[#allocation2 + $0x188] sm:$0xf] }
  0x3a   :  { %v1982_v6 = vor.u32 %v2521_v4, %v1981_v3  ;;  %v2555_v11 = vld [vmem:[#allocation2 + $0x18c] sm:$0xf]  ;;  %v2126_v12 = vor.u32 %v2557_v10, %v2125_v9  ;;  %v2127_v13 = vld [vmem:[#allocation2 + $0x198] sm:$0xf0]  ;;  %v2509_v40 = vld [vmem:[#allocation2 + $0x14] sm:$0xf0] }
  0x3b   :  { %677 = vmatpush.bf16.msrb.mxu0 %v2070_v14  ;;  %665 = vmatpush.bf16.msra.mxu3 %v1926_v16  ;;  %v2130_v14 = vor.u32 %v2555_v11, %v2127_v13  ;;  %v2517_v16 = vld [vmem:[#allocation2 + $0x54] sm:$0xf0]  ;;  %v1951_v31 = vld [vmem:[#allocation2 + $0x38] sm:$0xf0]  ;;  %v2365_v3 = vld [vmem:[#allocation5 + $0x170] sm:$0xf] }
  0x3c   :  { %686 = vmatpush.bf16.msrb.mxu1 %v2010_v18  ;;  %v2047_v18 = vld [vmem:[#allocation2 + $0xf8] sm:$0xf0]  ;;  %v2617_v4 = vld [vmem:[#allocation5 + $0x174] sm:$0xf0]  ;;  %v2583_v10 = vld [vmem:[#allocation5 + $0x64] sm:$0xf0] }
  0x3d   :  { %699 = vmatpush.bf16.msrb.mxu2 %v2138_v26  ;;  %v2050_v24 = vor.u32 %v2535_v17, %v2047_v18  ;;  %v2533_v26 = vld [vmem:[#allocation2 + $0xd4] sm:$0xf0]  ;;  %v2515_v17 = vld [vmem:[#allocation2 + $0x4c] sm:$0xf]  ;;  %v2357_v11 = vld [vmem:[#allocation5 + $0x160] sm:$0xf] }
  0x3e   :  { %v2030_v28 = vor.u32 %v2533_v26, %v2029_v25  ;;  %v2111_v25 = vld [vmem:[#allocation2 + $0x178] sm:$0xf0]  ;;  %v2301_v13 = vld [vmem:[#allocation5 + $0xf0] sm:$0xf]  ;;  %vm1278_vm4 = vcmask 400384   ;;  %vm1444_vm5 = vcmask 285696  }
  0x3f   :  { %710 = vmatpush.bf16.msrb.mxu3 %v2046_v22  ;;  %678 = vmatpush.bf16.msrb.mxu0 %v2054_v33  ;;  %v2553_v22 = vld [vmem:[#allocation2 + $0x174] sm:$0xf0]  ;;  %vm1321_vm6 = vcmask 1046528   ;;  %vm1317_vm9 = vcmask 56320   ;;  %vm1533_vm11 = vcmask 1044480   ;;  %vm1529_vm12 = vcmask 957440  }
  0x40   :  { %687 = vmatpush.bf16.msrb.mxu1 %v1994_v32  ;;  %v2034_v32 = vor.u32 %v2531_v27, %v2031_v29  ;;  %v1949_v27 = vld [vmem:[#allocation2 + $0x28] sm:$0xf]  ;;  %v2511_v29 = vld [vmem:[#allocation2 + $0x2c] sm:$0xf]  ;;  %v2549_v33 = vld [vmem:[#allocation2 + $0x154] sm:$0xf0] }
  0x41   :  { %700 = vmatpush.bf16.msrb.mxu2 %v2122_v38  ;;  %v2569_v38 = vld [vmem:[#allocation2 + $0x1f4] sm:$0xf0]  ;;  %v1954_v34 = vor.u32 %v2511_v29, %v1951_v31  ;;  %v2213_v29 = vld [vmem:[#allocation5 + $0x40] sm:$0xf]  ;;  %s1843_s23 = sshll.u32 %s3364_s18, 4  ;;  %s1844_s23 = int_to_ptr.hbm [resolvable:$true] %s1843_s23 }
  0x42   :  { %v2174_v41 = vor.u32 %v2569_v38, %v2173_v36  ;;  %v2547_v36 = vld [vmem:[#allocation2 + $0x14c] sm:$0xf]  ;;  %v1933_v38 = vld [vmem:[#allocation2 + $0x8] sm:$0xf] }
  0x43   :  { %711 = vmatpush.bf16.msrb.mxu3 %v2030_v28  ;;  %v2513_v28 = vld [vmem:[#allocation2 + $0x34] sm:$0xf0] }
  0x44   :  { %688 = vmatpush.bf16.msrb.mxu1 %v1978_v44  ;;  %v2529_v44 = vld [vmem:[#allocation2 + $0xb4] sm:$0xf0]  ;;  %723 = vmatpush.bf16.msra.mxu0 %v2174_v41  ;;  %v1950_v30 = vor.u32 %v2513_v28, %v1949_v27  ;;  %v2507_v41 = vld [vmem:[#allocation2 + $0xc] sm:$0xf]  ;;  %v2599_v27 = vld [vmem:[#allocation5 + $0xe4] sm:$0xf0] }
  0x45   :  { %701 = vmatpush.bf16.msrb.mxu2 %v2106_v51  ;;  %v2014_v46 = vor.u32 %v2529_v44, %v2013_v43  ;;  %v2563_v51 = vld [vmem:[#allocation2 + $0x1cc] sm:$0xf]  ;;  %v1934_v43 = vor.u32 %v2509_v40, %v1933_v38  ;;  %v2277_v38 = vld [vmem:[#allocation5 + $0xc0] sm:$0xf] }
  0x46   :  { %v2162_v54 = vor.u32 %v2563_v51, %v2159_v53  ;;  %v94_v51 = vld [vmem:[%s3352_s6 + $0x1] sm:$0x3]  ;;  %v2541_v53 = vld [vmem:[#allocation2 + $0x114] sm:$0xf0] }
  0x47   :  { %712 = vmatpush.bf16.msrb.mxu3 %v2014_v46  ;;  %v2545_v46 = vld [vmem:[#allocation2 + $0x134] sm:$0xf0] }
  0x48   :  { %689 = vmatpush.bf16.msrb.mxu1 %v1962_v58  ;;  %v1998_v58 = vor.u32 %v2525_v56, %v1997_v55  ;;  %724 = vmatpush.bf16.msra.mxu0 %v2158_v52  ;;  %v2061_v52 = vld [vmem:[#allocation2 + $0x108] sm:$0xf]  ;;  %v151_v55 = vperm.slane %v94_v51, 0 }
  0x49   :  { %702 = vmatpush.bf16.msrb.mxu2 %v2090_v1  ;;  %v2143_v1 = vld [vmem:[#allocation2 + $0x1b8] sm:$0xf0]  ;;  %v2062_v56 = vor.u32 %v2541_v53, %v2061_v52  ;;  %v2591_v52 = vld [vmem:[#allocation5 + $0xa4] sm:$0xf0]  ;;  %v2349_v53 = vld [vmem:[#allocation5 + $0x150] sm:$0xf] }
  0x4a   :  { %v2146_v2 = vor.u32 %v2559_v63, %v2143_v1  ;;  %v2237_v63 = vld [vmem:[#allocation5 + $0x70] sm:$0xf] }
  0x4b   :  { %713 = vmatpush.bf16.msrb.mxu3 %v1998_v58 }
  0x4c   :  { %690 = vmatpush.bf16.msrb.mxu1 %v1946_v7  ;;  %v1983_v7 = vld [vmem:[#allocation2 + $0x78] sm:$0xf0] }
  0x4d   :  { %703 = vmatpush.bf16.msrb.mxu2 %v2074_v15  ;;  %v1986_v8 = vor.u32 %v2519_v5, %v1983_v7  ;;  %v1965_v15 = vld [vmem:[#allocation2 + $0x48] sm:$0xf]  ;;  %v2229_v7 = vld [vmem:[#allocation5 + $0x60] sm:$0xf] }
  0x4e   :  { %v1966_v18 = vor.u32 %v2517_v16, %v1965_v15  ;;  %v2429_v15 = vld [vmem:[#allocation5 + $0x1f0] sm:$0xf]  ;;  %v2633_v16 = vld [vmem:[#allocation5 + $0x1f4] sm:$0xf0] }
  0x4f   :  { %714 = vmatpush.bf16.msrb.mxu3 %v1982_v6 }
  0x50   :  { %691 = vmatpush.bf16.msrb.mxu1 %v1930_v21  ;;  %v2109_v21 = vld [vmem:[#allocation2 + $0x168] sm:$0xf] }
  0x51   :  { %704 = vmatpush.bf16.msrb.mxu2 %v2058_v37  ;;  %v2095_v37 = vld [vmem:[#allocation2 + $0x158] sm:$0xf0] }
  0x52   :  { %v2098_v39 = vor.u32 %v2547_v36, %v2095_v37  ;;  %v2577_v36 = vld [vmem:[#allocation5 + $0x34] sm:$0xf0] }
  0x53   :  { %715 = vmatpush.bf16.msrb.mxu3 %v1966_v18 }
  0x57   :  { %716 = vmatpush.bf16.msrb.mxu3 %v1950_v30  ;;  %v2579_v30 = vld [vmem:[#allocation5 + $0x44] sm:$0xf0] }
  0x5b   :  { %717 = vmatpush.bf16.msrb.mxu3 %v1934_v43 }
  0x97   :  { %v128_v57 = vpop.f32.mrf.mxu0 }
  0x98   :  { %v129_v61 = vadd.f32 %v2643_v47, %v128_v57  ;;  %v2015_v47 = vld [vmem:[#allocation2 + $0xb8] sm:$0xf0]  ;;  %v2523_v57 = vld [vmem:[#allocation2 + $0x8c] sm:$0xf] }
  0x99   :  { %v2018_v48 = vor.u32 %v2527_v45, %v2015_v47  ;;  %v2002_v60 = vor.u32 %v2523_v57, %v1999_v59  ;;  %v2077_v45 = vld [vmem:[#allocation2 + $0x128] sm:$0xf]  ;;  %v2543_v47 = vld [vmem:[#allocation2 + $0x12c] sm:$0xf]  ;;  %v2063_v57 = vld [vmem:[#allocation2 + $0x118] sm:$0xf0] }
  0x9a   :  { %2648 = vtanh.f32 %v129_v61  ;;  %v2141_v61 = vld [vmem:[#allocation2 + $0x1a8] sm:$0xf]  ;;  %v2078_v49 = vor.u32 %v2545_v46, %v2077_v45  ;;  %v2593_v45 = vld [vmem:[#allocation5 + $0xb4] sm:$0xf0] }
  0x9b   :  { %v2142_v0 = vor.u32 %v2561_v62, %v2141_v61  ;;  %v152_v61 = vperm.slane %v94_v51, 1 }
  0x9d   :  { %725 = vmatpush.bf16.msra.mxu0 %v2142_v0  ;;  %v2585_v0 = vld [vmem:[#allocation5 + $0x74] sm:$0xf0] }
  0x9e   :  { %v2238_v6 = vor.u32 %v2585_v0, %v2237_v63  ;;  %v2589_v0 = vld [vmem:[#allocation5 + $0x94] sm:$0xf0] }
  0x9f   :  { %v130_v19 = vpop.f32.mrf.mxu0 }
  0xa0   :  { %v2649_v20 = vpop.eup %2648  ;;  %v1967_v19 = vld [vmem:[#allocation2 + $0x58] sm:$0xf0] }
  0xa1   :  { %v133_v23 = vpack.c.bf16 %v2649_v20, %v2649_v20  ;;  %726 = vmatpush.bf16.msra.mxu0 %v2126_v12  ;;  %v1970_v20 = vor.u32 %v2515_v17, %v1967_v19  ;;  %v2615_v12 = vld [vmem:[#allocation5 + $0x164] sm:$0xf0]  ;;  %v2230_v17 = vor.u32 %v2583_v10, %v2229_v7  ;;  %v2584_v7 = vld [vmem:[#allocation5 + $0x74] sm:$0xf] }
  0xa2   :  { %v2358_v18 = vor.u32 %v2615_v12, %v2357_v11  ;;  %v2245_v11 = vld [vmem:[#allocation5 + $0x80] sm:$0xf]  ;;  %v2587_v12 = vld [vmem:[#allocation5 + $0x84] sm:$0xf0] }
  0xa3   :  { %243 = vmatmul.bf16.vlgmr.msra.gmra.mxu1 %v133_v23  ;;  %256 = vmatmul.bf16.vlgmr.msra.gmra.mxu2 %v133_v23  ;;  %v2551_v23 = vld [vmem:[#allocation2 + $0x16c] sm:$0xf] }
  0xa4   :  { %736 = vmatpush.bf16.msra.mxu1 %v2050_v24  ;;  %749 = vmatpush.bf16.msra.mxu2 %v2178_v42  ;;  %v2110_v24 = vor.u32 %v2553_v22, %v2109_v21  ;;  %v2114_v26 = vor.u32 %v2551_v23, %v2111_v25  ;;  %v1935_v42 = vld [vmem:[#allocation2 + $0x18] sm:$0xf0]  ;;  %v2581_v21 = vld [vmem:[#allocation5 + $0x54] sm:$0xf0] }
  0xa5   :  { %v1938_v44 = vor.u32 %v2507_v41, %v1935_v42  ;;  %v2197_v41 = vld [vmem:[#allocation5 + $0x20] sm:$0xf]  ;;  %v2575_v42 = vld [vmem:[#allocation5 + $0x24] sm:$0xf0] }
  0xa6   :  { %727 = vmatpush.bf16.msra.mxu0 %v2110_v24  ;;  %v2430_v24 = vor.u32 %v2633_v16, %v2429_v15  ;;  %v2198_v46 = vor.u32 %v2575_v42, %v2197_v41  ;;  %v2609_v15 = vld [vmem:[#allocation5 + $0x134] sm:$0xf0]  ;;  %v2405_v16 = vld [vmem:[#allocation5 + $0x1c0] sm:$0xf]  ;;  %v2623_v42 = vld [vmem:[#allocation5 + $0x1a4] sm:$0xf0] }
  0xa8   :  { %737 = vmatpush.bf16.msra.mxu1 %v2034_v32  ;;  %750 = vmatpush.bf16.msra.mxu2 %v2162_v54  ;;  %v2093_v32 = vld [vmem:[#allocation2 + $0x148] sm:$0xf]  ;;  %v2539_v54 = vld [vmem:[#allocation2 + $0x10c] sm:$0xf] }
  0xa9   :  { %v2094_v35 = vor.u32 %v2549_v33, %v2093_v32  ;;  %v2066_v58 = vor.u32 %v2539_v54, %v2063_v57  ;;  %v2285_v32 = vld [vmem:[#allocation5 + $0xd0] sm:$0xf]  ;;  %v2597_v33 = vld [vmem:[#allocation5 + $0xd4] sm:$0xf0]  ;;  %v2421_v57 = vld [vmem:[#allocation5 + $0x1e0] sm:$0xf] }
  0xaa   :  { %v2286_v37 = vor.u32 %v2597_v33, %v2285_v32  ;;  %v2613_v54 = vld [vmem:[#allocation5 + $0x154] sm:$0xf0]  ;;  %v2223_v32 = vld [vmem:[#allocation5 + $0x58] sm:$0xf0] }
  0xab   :  { %728 = vmatpush.bf16.msra.mxu0 %v2094_v35  ;;  %v2205_v35 = vld [vmem:[#allocation5 + $0x30] sm:$0xf] }
  0xac   :  { %738 = vmatpush.bf16.msra.mxu1 %v2018_v48  ;;  %751 = vmatpush.bf16.msra.mxu2 %v2146_v2  ;;  %v2079_v48 = vld [vmem:[#allocation2 + $0x138] sm:$0xf0]  ;;  %v2206_v40 = vor.u32 %v2577_v36, %v2205_v35  ;;  %v2598_v35 = vld [vmem:[#allocation5 + $0xe4] sm:$0xf]  ;;  %v2295_v36 = vld [vmem:[#allocation5 + $0xe8] sm:$0xf0] }
  0xad   :  { %v2082_v50 = vor.u32 %v2543_v47, %v2079_v48  ;;  %v2189_v48 = vld [vmem:[#allocation5 + $0x10] sm:$0xf] }
  0xaf   :  { %729 = vmatpush.bf16.msra.mxu0 %v2078_v49  ;;  %v2573_v49 = vld [vmem:[#allocation5 + $0x14] sm:$0xf0] }
  0xb0   :  { %739 = vmatpush.bf16.msra.mxu1 %v2002_v60  ;;  %752 = vmatpush.bf16.msra.mxu2 %v2130_v14  ;;  %v2601_v14 = vld [vmem:[#allocation5 + $0xf4] sm:$0xf0]  ;;  %v2190_v51 = vor.u32 %v2573_v49, %v2189_v48  ;;  %v2287_v48 = vld [vmem:[#allocation5 + $0xd8] sm:$0xf0] }
  0xb1   :  { %v2302_v23 = vor.u32 %v2601_v14, %v2301_v13  ;;  %v2333_v13 = vld [vmem:[#allocation5 + $0x130] sm:$0xf]  ;;  %v2246_v14 = vor.u32 %v2587_v12, %v2245_v11 }
  0xb3   :  { %730 = vmatpush.bf16.msra.mxu0 %v2062_v56  ;;  %v2350_v56 = vor.u32 %v2613_v54, %v2349_v53  ;;  %v2621_v54 = vld [vmem:[#allocation5 + $0x194] sm:$0xf0] }
  0xb4   :  { %740 = vmatpush.bf16.msra.mxu1 %v1986_v8  ;;  %753 = vmatpush.bf16.msra.mxu2 %v2114_v26  ;;  %v2366_v8 = vor.u32 %v2617_v4, %v2365_v3  ;;  %v2293_v26 = vld [vmem:[#allocation5 + $0xe0] sm:$0xf] }
  0xb5   :  { %v2294_v31 = vor.u32 %v2599_v27, %v2293_v26  ;;  %v2325_v26 = vld [vmem:[#allocation5 + $0x120] sm:$0xf]  ;;  %v2607_v27 = vld [vmem:[#allocation5 + $0x124] sm:$0xf0] }
  0xb8   :  { %741 = vmatpush.bf16.msra.mxu1 %v1970_v20  ;;  %754 = vmatpush.bf16.msra.mxu2 %v2098_v39  ;;  %v2221_v20 = vld [vmem:[#allocation5 + $0x50] sm:$0xf]  ;;  %v2595_v39 = vld [vmem:[#allocation5 + $0xc4] sm:$0xf0] }
  0xb9   :  { %v2222_v28 = vor.u32 %v2581_v21, %v2221_v20  ;;  %v2278_v43 = vor.u32 %v2595_v39, %v2277_v38  ;;  %v2582_v20 = vld [vmem:[#allocation5 + $0x64] sm:$0xf]  ;;  %v2231_v21 = vld [vmem:[#allocation5 + $0x68] sm:$0xf0]  ;;  %v2317_v38 = vld [vmem:[#allocation5 + $0x110] sm:$0xf] }
  0xba   :  { %v2605_v39 = vld [vmem:[#allocation5 + $0x114] sm:$0xf0] }
  0xbb   :  { %v2318_v41 = vor.u32 %v2605_v39, %v2317_v38  ;;  %v2628_v39 = vld [vmem:[#allocation5 + $0x1d4] sm:$0xf] }
  0xbc   :  { %742 = vmatpush.bf16.msra.mxu1 %v1954_v34  ;;  %755 = vmatpush.bf16.msra.mxu2 %v2082_v50  ;;  %v2214_v34 = vor.u32 %v2579_v30, %v2213_v29  ;;  %v2261_v50 = vld [vmem:[#allocation5 + $0xa0] sm:$0xf]  ;;  %v2326_v29 = vor.u32 %v2607_v27, %v2325_v26  ;;  %v2625_v30 = vld [vmem:[#allocation5 + $0x1b4] sm:$0xf0]  ;;  %v2423_v26 = vld [vmem:[#allocation5 + $0x1e8] sm:$0xf0] }
  0xc0   :  { %743 = vmatpush.bf16.msra.mxu1 %v1938_v44  ;;  %756 = vmatpush.bf16.msra.mxu2 %v2066_v58  ;;  %v2269_v44 = vld [vmem:[#allocation5 + $0xb0] sm:$0xf]  ;;  %v2631_v58 = vld [vmem:[#allocation5 + $0x1e4] sm:$0xf0] }
  0xc1   :  { %v2270_v47 = vor.u32 %v2593_v45, %v2269_v44  ;;  %v2215_v44 = vld [vmem:[#allocation5 + $0x48] sm:$0xf0] }
 0x120   :  { %v244_v59 = vpop.f32.mrf.mxu1 }
 0x121   :  { %v245_v60 = vadd.f32 %v244_v59, %v151_v55  ;;  %v2262_v55 = vor.u32 %v2591_v52, %v2261_v50  ;;  %v2422_v59 = vor.u32 %v2631_v58, %v2421_v57  ;;  %v2309_v50 = vld [vmem:[#allocation5 + $0x100] sm:$0xf]  ;;  %v2381_v52 = vld [vmem:[#allocation5 + $0x190] sm:$0xf] }
 0x122   :  { %v2382_v57 = vor.u32 %v2621_v54, %v2381_v52  ;;  %v2606_v54 = vld [vmem:[#allocation5 + $0x124] sm:$0xf] }
 0x123   :  { %2650 = vtanh.f32 %v245_v60  ;;  %v2181_v60 = vld [vmem:[#allocation5] sm:$0xf] }
 0x126   :  { %v257_v62 = vpop.f32.mrf.mxu2 }
 0x127   :  { %v258_v1 = vadd.f32 %v257_v62, %v152_v61  ;;  %v2571_v61 = vld [vmem:[#allocation5 + $0x4] sm:$0xf0]  ;;  %v2253_v62 = vld [vmem:[#allocation5 + $0x90] sm:$0xf] }
 0x128   :  { %v246_v2 = vpop.f32.mrf.mxu1  ;;  %v2182_v63 = vor.u32 %v2571_v61, %v2181_v60  ;;  %v2254_v3 = vor.u32 %v2589_v0, %v2253_v62  ;;  %v2279_v60 = vld [vmem:[#allocation5 + $0xc8] sm:$0xf0]  ;;  %v2616_v61 = vld [vmem:[#allocation5 + $0x174] sm:$0xf] }
 0x129   :  { %v2651_v5 = vpop.eup %2650  ;;  %2652 = vtanh.f32 %v258_v1  ;;  %v2341_v1 = vld [vmem:[#allocation5 + $0x140] sm:$0xf]  ;;  %v2611_v2 = vld [vmem:[#allocation5 + $0x144] sm:$0xf0] }
 0x12a   :  { %v263_v9 = vpack.c.bf16 %v2651_v5, %v2651_v5  ;;  %v2342_v4 = vor.u32 %v2611_v2, %v2341_v1  ;;  %v2413_v5 = vld [vmem:[#allocation5 + $0x1d0] sm:$0xf]  ;;  %v2373_v1 = vld [vmem:[#allocation5 + $0x180] sm:$0xf]  ;;  %v2619_v2 = vld [vmem:[#allocation5 + $0x184] sm:$0xf0] }
 0x12c   :  { %666 = vmatmul.bf16.vlgmr.msra.gmra.mxu3 %v263_v9  ;;  %692 = vmatmul.bf16.vlgmr.msrb.gmra.mxu1 %v263_v9 }
 0x12d   :  { %1159 = vmatpush.bf16.msra.mxu3 %v2238_v6  ;;  %1185 = vmatpush.bf16.msrb.mxu1 %v2366_v8  ;;  %v2629_v6 = vld [vmem:[#allocation5 + $0x1d4] sm:$0xf0] }
 0x12e   :  { %v259_v19 = vpop.f32.mrf.mxu2  ;;  %v2414_v8 = vor.u32 %v2629_v6, %v2413_v5  ;;  %v2199_v5 = vld [vmem:[#allocation5 + $0x28] sm:$0xf0]  ;;  %v2592_v6 = vld [vmem:[#allocation5 + $0xb4] sm:$0xf] }
 0x12f   :  { %v2653_v22 = vpop.eup %2652 }
 0x130   :  { %v264_v25 = vpack.c.bf16 %v2653_v22, %v2653_v22  ;;  %v2600_v22 = vld [vmem:[#allocation5 + $0xf4] sm:$0xf] }
 0x131   :  { %1160 = vmatpush.bf16.msra.mxu3 %v2230_v17  ;;  %1186 = vmatpush.bf16.msrb.mxu1 %v2358_v18  ;;  %v2627_v17 = vld [vmem:[#allocation5 + $0x1c4] sm:$0xf0]  ;;  %v2334_v18 = vor.u32 %v2609_v15, %v2333_v13  ;;  %v2632_v13 = vld [vmem:[#allocation5 + $0x1f4] sm:$0xf] }
 0x132   :  { %679 = vmatmul.bf16.vlgmr.msrb.gmra.mxu0 %v264_v25  ;;  %705 = vmatmul.bf16.vlgmr.msrb.gmra.mxu2 %v264_v25  ;;  %v2406_v19 = vor.u32 %v2627_v17, %v2405_v16  ;;  %v2572_v16 = vld [vmem:[#allocation5 + $0x14] sm:$0xf]  ;;  %v2191_v17 = vld [vmem:[#allocation5 + $0x18] sm:$0xf0] }
 0x133   :  { %1172 = vmatpush.bf16.msrb.mxu0 %v2302_v23  ;;  %1198 = vmatpush.bf16.msrb.mxu2 %v2430_v24  ;;  %v2234_v23 = vor.u32 %v2582_v20, %v2231_v21  ;;  %v2303_v24 = vld [vmem:[#allocation5 + $0xf8] sm:$0xf0]  ;;  %v2263_v20 = vld [vmem:[#allocation5 + $0xa8] sm:$0xf0]  ;;  %v2612_v21 = vld [vmem:[#allocation5 + $0x154] sm:$0xf] }
 0x135   :  { %1161 = vmatpush.bf16.msra.mxu3 %v2222_v28  ;;  %1187 = vmatpush.bf16.msrb.mxu1 %v2350_v56  ;;  %v2397_v28 = vld [vmem:[#allocation5 + $0x1b0] sm:$0xf]  ;;  %v2207_v56 = vld [vmem:[#allocation5 + $0x38] sm:$0xf0] }
 0x136   :  { %v2398_v33 = vor.u32 %v2625_v30, %v2397_v28  ;;  %v2570_v28 = vld [vmem:[#allocation5 + $0x4] sm:$0xf]  ;;  %v2588_v30 = vld [vmem:[#allocation5 + $0x94] sm:$0xf] }
 0x137   :  { %1173 = vmatpush.bf16.msrb.mxu0 %v2294_v31  ;;  %1199 = vmatpush.bf16.msrb.mxu2 %v2422_v59  ;;  %v2580_v31 = vld [vmem:[#allocation5 + $0x54] sm:$0xf]  ;;  %v2594_v59 = vld [vmem:[#allocation5 + $0xc4] sm:$0xf] }
 0x138   :  { %v2282_v62 = vor.u32 %v2594_v59, %v2279_v60  ;;  %v2399_v59 = vld [vmem:[#allocation5 + $0x1b8] sm:$0xf0] }
 0x139   :  { %1162 = vmatpush.bf16.msra.mxu3 %v2214_v34  ;;  %1188 = vmatpush.bf16.msrb.mxu1 %v2342_v4  ;;  %v2226_v34 = vor.u32 %v2580_v31, %v2223_v32  ;;  %v2574_v4 = vld [vmem:[#allocation5 + $0x24] sm:$0xf]  ;;  %v2255_v32 = vld [vmem:[#allocation5 + $0x98] sm:$0xf0] }
 0x13b   :  { %1174 = vmatpush.bf16.msrb.mxu0 %v2286_v37  ;;  %1200 = vmatpush.bf16.msrb.mxu2 %v2414_v8  ;;  %v2298_v37 = vor.u32 %v2598_v35, %v2295_v36  ;;  %v2271_v8 = vld [vmem:[#allocation5 + $0xb8] sm:$0xf0]  ;;  %v2964_v35 = vld [vmem:[%s3352_s6 + $0x3] sm:$0xf] }
 0x13c   :  { %718 = vmatmul.bf16.vlgmr.msrb.gmra.mxu3 %v263_v9  ;;  %744 = vmatmul.bf16.vlgmr.msra.gmra.mxu1 %v263_v9  ;;  %v2239_v9 = vld [vmem:[#allocation5 + $0x78] sm:$0xf0]  ;;  %v2274_v11 = vor.u32 %v2592_v6, %v2271_v8 }
 0x13d   :  { %1163 = vmatpush.bf16.msra.mxu3 %v2206_v40  ;;  %v2242_v10 = vor.u32 %v2584_v7, %v2239_v9  ;;  %1189 = vmatpush.bf16.msrb.mxu1 %v2334_v18  ;;  %v2389_v40 = vld [vmem:[#allocation5 + $0x1a0] sm:$0xf]  ;;  %v2202_v7 = vor.u32 %v2574_v4, %v2199_v5  ;;  %v2614_v9 = vld [vmem:[#allocation5 + $0x164] sm:$0xf] }
 0x13e   :  { %v2390_v45 = vor.u32 %v2623_v42, %v2389_v40  ;;  %v2590_v18 = vld [vmem:[#allocation5 + $0xa4] sm:$0xf]  ;;  %v2415_v40 = vld [vmem:[#allocation5 + $0x1d8] sm:$0xf0] }
 0x13f   :  { %1175 = vmatpush.bf16.msrb.mxu0 %v2278_v43  ;;  %1201 = vmatpush.bf16.msrb.mxu2 %v2406_v19  ;;  %v2578_v43 = vld [vmem:[#allocation5 + $0x44] sm:$0xf]  ;;  %v2194_v19 = vor.u32 %v2572_v16, %v2191_v17  ;;  %v2418_v42 = vor.u32 %v2628_v39, %v2415_v40 }
 0x141   :  { %1164 = vmatpush.bf16.msra.mxu3 %v2198_v46  ;;  %1190 = vmatpush.bf16.msrb.mxu1 %v2326_v29  ;;  %v2218_v46 = vor.u32 %v2578_v43, %v2215_v44  ;;  %v2183_v29 = vld [vmem:[#allocation5 + $0x8] sm:$0xf0]  ;;  %v2586_v43 = vld [vmem:[#allocation5 + $0x84] sm:$0xf] }
 0x142   :  { %731 = vmatmul.bf16.vlgmr.msra.gmra.mxu0 %v264_v25  ;;  %757 = vmatmul.bf16.vlgmr.msra.gmra.mxu2 %v264_v25  ;;  %v2306_v25 = vor.u32 %v2600_v22, %v2303_v24  ;;  %v2351_v22 = vld [vmem:[#allocation5 + $0x158] sm:$0xf0]  ;;  %v2186_v31 = vor.u32 %v2570_v28, %v2183_v29  ;;  %v2247_v44 = vld [vmem:[#allocation5 + $0x88] sm:$0xf0]  ;;  %v333_v29 = vperm.slane %v2964_v35, 3 }
 0x143   :  { %1176 = vmatpush.bf16.msrb.mxu0 %v2270_v47  ;;  %1202 = vmatpush.bf16.msrb.mxu2 %v2398_v33  ;;  %v2596_v47 = vld [vmem:[#allocation5 + $0xd4] sm:$0xf]  ;;  %v2354_v24 = vor.u32 %v2612_v21, %v2351_v22  ;;  %v2610_v33 = vld [vmem:[#allocation5 + $0x144] sm:$0xf]  ;;  %v2375_v21 = vld [vmem:[#allocation5 + $0x188] sm:$0xf0] }
 0x144   :  { %v2290_v49 = vor.u32 %v2596_v47, %v2287_v48  ;;  %v2335_v47 = vld [vmem:[#allocation5 + $0x138] sm:$0xf0]  ;;  %v2626_v48 = vld [vmem:[#allocation5 + $0x1c4] sm:$0xf]  ;;  %v332_v22 = vperm.slane %v2964_v35, 2 }
 0x145   :  { %1165 = vmatpush.bf16.msra.mxu3 %v2190_v51  ;;  %1191 = vmatpush.bf16.msrb.mxu1 %v2318_v41  ;;  %v2603_v51 = vld [vmem:[#allocation5 + $0x104] sm:$0xf0]  ;;  %v330_v41 = vperm.slane %v2964_v35, 0 }
 0x146   :  { %v2310_v53 = vor.u32 %v2603_v51, %v2309_v50 }
 0x147   :  { %1177 = vmatpush.bf16.msrb.mxu0 %v2262_v55  ;;  %1203 = vmatpush.bf16.msrb.mxu2 %v2390_v45  ;;  %v2576_v55 = vld [vmem:[#allocation5 + $0x34] sm:$0xf] }
 0x148   :  { %v2210_v58 = vor.u32 %v2576_v55, %v2207_v56  ;;  %v2608_v45 = vld [vmem:[#allocation5 + $0x134] sm:$0xf]  ;;  %v2327_v55 = vld [vmem:[#allocation5 + $0x128] sm:$0xf0] }
 0x149   :  { %1166 = vmatpush.bf16.msra.mxu3 %v2182_v63  ;;  %v2367_v63 = vld [vmem:[#allocation5 + $0x178] sm:$0xf0]  ;;  %1192 = vmatpush.bf16.msrb.mxu1 %v2310_v53  ;;  %v2338_v50 = vor.u32 %v2608_v45, %v2335_v47  ;;  %v2624_v56 = vld [vmem:[#allocation5 + $0x1b4] sm:$0xf]  ;;  %v1275_v45 = vld [vmem:[%s3354_s8 + $0x20] sm:$0xff] }
 0x14a   :  { %v2370_v0 = vor.u32 %v2616_v61, %v2367_v63  ;;  %v2330_v61 = vor.u32 %v2606_v54, %v2327_v55  ;;  %v2604_v63 = vld [vmem:[#allocation5 + $0x114] sm:$0xf]  ;;  %v1439_v54 = vld [vmem:[%s3358_s12 + $0x28] sm:$0xff]  ;;  %v1437_v55 = vld [vmem:[%s3358_s12 + $0x18] sm:$0xff] }
 0x14b   :  { %1178 = vmatpush.bf16.msrb.mxu0 %v2254_v3  ;;  %1204 = vmatpush.bf16.msrb.mxu2 %v2382_v57  ;;  %v2374_v3 = vor.u32 %v2619_v2, %v2373_v1  ;;  %v331_v57 = vperm.slane %v2964_v35, 1  ;;  %v2319_v1 = vld [vmem:[#allocation5 + $0x118] sm:$0xf0]  ;;  %v2622_v2 = vld [vmem:[#allocation5 + $0x1a4] sm:$0xf]  ;;  %v1273_v47 = vld [vmem:[%s3354_s8 + $0x10] sm:$0xff] }
 0x14c   :  { %v2322_v6 = vor.u32 %v2604_v63, %v2319_v1  ;;  %v1277_v35 = vld [vmem:[%s3354_s8 + $0x30] sm:$0x1] }
 0x14d   :  { %1211 = vmatpush.bf16.msrb.mxu3 %v2242_v10  ;;  %v2359_v10 = vld [vmem:[#allocation5 + $0x168] sm:$0xf0]  ;;  %1237 = vmatpush.bf16.msra.mxu1 %v2370_v0 }
 0x14e   :  { %v2362_v12 = vor.u32 %v2614_v9, %v2359_v10  ;;  %v2602_v9 = vld [vmem:[#allocation5 + $0x104] sm:$0xf]  ;;  %v2311_v10 = vld [vmem:[#allocation5 + $0x108] sm:$0xf0] }
 0x14f   :  { %1179 = vmatpush.bf16.msrb.mxu0 %v2246_v14  ;;  %v2431_v14 = vld [vmem:[#allocation5 + $0x1f8] sm:$0xf0]  ;;  %1205 = vmatpush.bf16.msrb.mxu2 %v2374_v3  ;;  %v2391_v3 = vld [vmem:[#allocation5 + $0x1a8] sm:$0xf0]  ;;  %v2314_v16 = vor.u32 %v2602_v9, %v2311_v10  ;;  %v2644_v9 = vld [vmem:[%s3353_s7] ss:$0 sm:$0xff] }
 0x150   :  { %v2434_v15 = vor.u32 %v2632_v13, %v2431_v14  ;;  %v2620_v13 = vld [vmem:[#allocation5 + $0x194] sm:$0xf]  ;;  %v2383_v14 = vld [vmem:[#allocation5 + $0x198] sm:$0xf0] }
 0x151   :  { %1212 = vmatpush.bf16.msrb.mxu3 %v2234_v23  ;;  %1238 = vmatpush.bf16.msra.mxu1 %v2362_v12  ;;  %v2266_v23 = vor.u32 %v2590_v18, %v2263_v20  ;;  %v2386_v18 = vor.u32 %v2620_v13, %v2383_v14  ;;  %v2618_v20 = vld [vmem:[#allocation5 + $0x184] sm:$0xf]  ;;  %v2748_v13 = vmov 0.0  }
 0x153   :  { %1224 = vmatpush.bf16.msra.mxu0 %v2306_v25  ;;  %1250 = vmatpush.bf16.msra.mxu2 %v2434_v15  ;;  %v2630_v25 = vld [vmem:[#allocation5 + $0x1e4] sm:$0xf] }
 0x154   :  { %v2426_v27 = vor.u32 %v2630_v25, %v2423_v26  ;;  %v2378_v25 = vor.u32 %v2618_v20, %v2375_v21 }
 0x155   :  { %1213 = vmatpush.bf16.msrb.mxu3 %v2226_v34  ;;  %v2343_v34 = vld [vmem:[#allocation5 + $0x148] sm:$0xf0]  ;;  %1239 = vmatpush.bf16.msra.mxu1 %v2354_v24 }
 0x156   :  { %v2346_v38 = vor.u32 %v2610_v33, %v2343_v34 }
 0x157   :  { %1225 = vmatpush.bf16.msra.mxu0 %v2298_v37  ;;  %1251 = vmatpush.bf16.msra.mxu2 %v2426_v27  ;;  %v2258_v37 = vor.u32 %v2588_v30, %v2255_v32 }
 0x159   :  { %1214 = vmatpush.bf16.msrb.mxu3 %v2218_v46  ;;  %v2250_v46 = vor.u32 %v2586_v43, %v2247_v44  ;;  %1240 = vmatpush.bf16.msra.mxu1 %v2346_v38  ;;  %v1276_v44 = vld [vmem:[%s3354_s8 + $0x28] sm:$0xff] }
 0x15b   :  { %1226 = vmatpush.bf16.msra.mxu0 %v2290_v49  ;;  %v2407_v49 = vld [vmem:[#allocation5 + $0x1c8] sm:$0xf0]  ;;  %1252 = vmatpush.bf16.msra.mxu2 %v2418_v42 }
 0x15c   :  { %v2410_v51 = vor.u32 %v2626_v48, %v2407_v49  ;;  %v1272_v48 = vld [vmem:[%s3354_s8 + $0x8] sm:$0xff]  ;;  %v1271_v49 = vld [vmem:[%s3354_s8] sm:$0xff] }
 0x15d   :  { %1215 = vmatpush.bf16.msrb.mxu3 %v2210_v58  ;;  %1241 = vmatpush.bf16.msra.mxu1 %v2338_v50  ;;  %v1443_v50 = vld [vmem:[%s3358_s12 + $0x48] sm:$0x7] }
 0x15f   :  { %1227 = vmatpush.bf16.msra.mxu0 %v2282_v62  ;;  %1253 = vmatpush.bf16.msra.mxu2 %v2410_v51  ;;  %v2402_v62 = vor.u32 %v2624_v56, %v2399_v59  ;;  %v1435_v56 = vld [vmem:[%s3358_s12 + $0x8] sm:$0xff] }
 0x161   :  { %1216 = vmatpush.bf16.msrb.mxu3 %v2202_v7  ;;  %1242 = vmatpush.bf16.msra.mxu1 %v2330_v61  ;;  %v2394_v7 = vor.u32 %v2622_v2, %v2391_v3 }
 0x163   :  { %1228 = vmatpush.bf16.msra.mxu0 %v2274_v11  ;;  %1254 = vmatpush.bf16.msra.mxu2 %v2402_v62 }
 0x165   :  { %1217 = vmatpush.bf16.msrb.mxu3 %v2194_v19  ;;  %1243 = vmatpush.bf16.msra.mxu1 %v2322_v6 }
 0x167   :  { %1229 = vmatpush.bf16.msra.mxu0 %v2266_v23  ;;  %1255 = vmatpush.bf16.msra.mxu2 %v2394_v7 }
 0x169   :  { %1218 = vmatpush.bf16.msrb.mxu3 %v2186_v31  ;;  %1244 = vmatpush.bf16.msra.mxu1 %v2314_v16 }
 0x16b   :  { %1230 = vmatpush.bf16.msra.mxu0 %v2258_v37  ;;  %1256 = vmatpush.bf16.msra.mxu2 %v2386_v18 }
 0x16f   :  { %1231 = vmatpush.bf16.msra.mxu0 %v2250_v46  ;;  %1257 = vmatpush.bf16.msra.mxu2 %v2378_v25  ;;  %v1274_v46 = vld [vmem:[%s3354_s8 + $0x18] sm:$0xff] }
 0x1a9   :  { %v693_v36 = vpop.f32.mrf.mxu1 }
 0x1aa   :  { %v694_v4 = vadd.f32 %v693_v36, %v331_v57  ;;  %v96_v57 = vld [vmem:[%s3352_s6 + $0x7] sm:$0x3] }
 0x1af   :  { %v667_v52 = vpop.f32.mrf.mxu3  ;;  %v680_v53 = vpop.f32.mrf.mxu0 }
 0x1b0   :  { %v668_v58 = vadd.f32 %v667_v52, %v330_v41  ;;  %v1441_v52 = vld [vmem:[%s3358_s12 + $0x38] sm:$0xff] }
 0x1b1   :  { %v695_v60 = vpop.f32.mrf.mxu1 }
 0x1b2   :  { %v681_v0 = vadd.f32 %v680_v53, %v668_v58  ;;  %v835_v60 = vperm.slane %v96_v57, 0 }
 0x1b4   :  { %2654 = vtanh.f32 %v681_v0 }
 0x1b5   :  { %v706_v5 = vpop.f32.mrf.mxu2 }
 0x1b6   :  { %v707_v8 = vadd.f32 %v706_v5, %v694_v4  ;;  %v3014_v4 = vld [vmem:[%s3370_s25] sm:$0xff] }
 0x1b7   :  { %v669_v11 = vpop.f32.mrf.mxu3  ;;  %v682_v12 = vpop.f32.mrf.mxu0 }
 0x1b8   :  { %2656 = vtanh.f32 %v707_v8  ;;  %v836_v11 = vperm.slane %v96_v57, 1  ;;  %v2645_v12 = vld [vmem:[%s3353_s7 + $0x1] ss:$0 sm:$0xff]  ;;  %v1512_v57 = vld [vmem:[%s3359_s13 + $0x78] sm:$0xff] }
 0x1b9   :  { %v745_v15 = vpop.f32.mrf.mxu1 }
 0x1ba   :  { %v2655_v17 = vpop.eup %2654  ;;  %v746_v33 = vadd.f32 %v745_v15, %v333_v29  ;;  %v1384_v29 = vld [vmem:[%s3357_s11 + $0x68] sm:$0x1] }
 0x1bb   :  { %v766_v19 = vpack.c.bf16 %v2655_v17, %v2655_v17 }
 0x1bd   :  { %v708_v23 = vpop.f32.mrf.mxu2  ;;  %1167 = vmatmul.bf16.vlgmr.msra.gmra.mxu3 %v766_v19 }
 0x1be   :  { %v2657_v24 = vpop.eup %2656  ;;  %2436 = vmatpush.msk.msra.mxu3 %vm1282_vm1, %v1277_v35  ;;  %v1378_v35 = vld [vmem:[%s3357_s11 + $0x38] sm:$0xff] }
 0x1bf   :  { %v767_v26 = vpack.c.bf16 %v2657_v24, %v2657_v24  ;;  %v719_v27 = vpop.f32.mrf.mxu3  ;;  %v732_v28 = vpop.f32.mrf.mxu0 }
 0x1c0   :  { %v720_v30 = vadd.f32 %v719_v27, %v332_v22  ;;  %1296 = vmatpush.msra.mxu3 %v1276_v44  ;;  %v1346_v27 = vld [vmem:[%s3356_s10] sm:$0x7f]  ;;  %s2750_s10 = smov [#allocation7]  }
 0x1c1   :  { %v747_v31 = vpop.f32.mrf.mxu1  ;;  %1180 = vmatmul.bf16.vlgmr.msrb.gmra.mxu0 %v767_v26  ;;  %v1375_v44 = vld [vmem:[%s3357_s11 + $0x20] sm:$0xff]  ;;  %s1841_s21 = sshll.u32 %s2750_s10, 4  ;;  %s1842_s21 = int_to_ptr.vmem [resolvable:$true] %s1841_s21 }
 0x1c2   :  { %v733_v32 = vadd.f32 %v732_v28, %v720_v30  ;;  %1297 = vmatpush.msra.mxu3 %v1275_v45  ;;  %v1383_v28 = vld [vmem:[%s3357_s11 + $0x60] sm:$0x1]  ;;  %v1381_v30 = vld [vmem:[%s3357_s11 + $0x50] sm:$0xff]  ;;  %v1382_v31 = vld [vmem:[%s3357_s11 + $0x58] sm:$0xff] }
 0x1c3   :  { %v1376_v45 = vld [vmem:[%s3357_s11 + $0x28] sm:$0xff] }
 0x1c4   :  { %2658 = vtanh.f32 %v733_v32  ;;  %1298 = vmatpush.msra.mxu3 %v1274_v46  ;;  %v1379_v32 = vld [vmem:[%s3357_s11 + $0x40] sm:$0xff]  ;;  %v1373_v46 = vld [vmem:[%s3357_s11 + $0x10] sm:$0xff] }
 0x1c5   :  { %v758_v34 = vpop.f32.mrf.mxu2 }
 0x1c6   :  { %v759_v36 = vadd.f32 %v758_v34, %v746_v33  ;;  %1299 = vmatpush.msra.mxu3 %v1273_v47  ;;  %v1374_v47 = vld [vmem:[%s3357_s11 + $0x18] sm:$0xff] }
 0x1c7   :  { %v721_v37 = vpop.f32.mrf.mxu3  ;;  %v734_v38 = vpop.f32.mrf.mxu0 }
 0x1c8   :  { %2660 = vtanh.f32 %v759_v36  ;;  %1300 = vmatpush.msra.mxu3 %v1272_v48  ;;  %v1371_v48 = vld [vmem:[%s3357_s11] sm:$0xff] }
 0x1ca   :  { %v2659_v39 = vpop.eup %2658  ;;  %1301 = vmatpush.msra.mxu3 %v1271_v49  ;;  %v1372_v49 = vld [vmem:[%s3357_s11 + $0x8] sm:$0xff] }
 0x1cb   :  { %v768_v40 = vpack.c.bf16 %v2659_v39, %v2659_v39 }
 0x1cd   :  { %v760_v41 = vpop.f32.mrf.mxu2  ;;  %1193 = vmatmul.bf16.vlgmr.msrb.gmra.mxu1 %v768_v40  ;;  %1219 = vmatmul.bf16.vlgmr.msrb.gmra.mxu3 %v766_v19 }
 0x1ce   :  { %v2661_v42 = vpop.eup %2660  ;;  %2448 = vmatpush.msk.msrb.mxu1 %vm1448_vm2, %v1443_v50  ;;  %2440 = vmatpush.msk.msrb.mxu3 %vm1321_vm6, %v1346_v27  ;;  %v1442_v50 = vld [vmem:[%s3358_s12 + $0x40] sm:$0x7]  ;;  %v1776_v27 = vld [vmem:[%s3362_s16 + $0x28] sm:$0xff] }
 0x1cf   :  { %v769_v43 = vpack.c.bf16 %v2661_v42, %v2661_v42  ;;  %v1380_v42 = vld [vmem:[%s3357_s11 + $0x48] sm:$0xff] }
 0x1d0   :  { %1487 = vmatpush.msrb.mxu1 %v1441_v52  ;;  %v1438_v52 = vld [vmem:[%s3358_s12 + $0x20] sm:$0xff] }
 0x1d1   :  { %1206 = vmatmul.bf16.vlgmr.msrb.gmra.mxu2 %v769_v43  ;;  %1232 = vmatmul.bf16.vlgmr.msra.gmra.mxu0 %v767_v26  ;;  %v1316_v26 = vld [vmem:[%s3355_s9] sm:$0x7f] }
 0x1d2   :  { %1488 = vmatpush.msrb.mxu1 %v1439_v54  ;;  %2438 = vmatpush.msk.msrb.mxu0 %vm1321_vm6, %v1316_v26  ;;  %v1434_v54 = vld [vmem:[%s3358_s12] sm:$0xff]  ;;  %v1499_v26 = vld [vmem:[%s3359_s13 + $0x10] sm:$0xff] }
 0x1d3   :  { %1537 = vmatpush.msrb.mxu2 %v1512_v57  ;;  %v2469_v57 = vld [vmem:[%s3360_s14 + $0x80] sm:$0xff] }
 0x1d4   :  { %1489 = vmatpush.msrb.mxu1 %v1437_v55  ;;  %2442 = vmatpush.msk.msra.mxu0 %vm1282_vm1, %v1383_v28  ;;  %v1527_v55 = vld [vmem:[%s3359_s13 + $0xf0] sm:$0x1f]  ;;  %v1498_v28 = vld [vmem:[%s3359_s13 + $0x8] sm:$0xff] }
 0x1d6   :  { %1490 = vmatpush.msrb.mxu1 %v1435_v56  ;;  %1404 = vmatpush.msra.mxu0 %v1381_v30  ;;  %v1526_v56 = vld [vmem:[%s3359_s13 + $0xe8] sm:$0xff]  ;;  %v1497_v30 = vld [vmem:[%s3359_s13] sm:$0xff] }
 0x1d8   :  { %1405 = vmatpush.msra.mxu0 %v1379_v32  ;;  %v1773_v32 = vld [vmem:[%s3362_s16 + $0x10] sm:$0xff] }
 0x1dd   :  { %1245 = vmatmul.bf16.vlgmr.msra.gmra.mxu1 %v768_v40 }
 0x1e1   :  { %1258 = vmatmul.bf16.vlgmr.msra.gmra.mxu2 %v769_v43  ;;  %v1377_v43 = vld [vmem:[%s3357_s11 + $0x30] sm:$0xff]  ;;  %s2749_s11 = smov 64  }
 0x1e2   :  { %1406 = vmatpush.msra.mxu0 %v1377_v43  ;;  %1578 = vrot.lane.b32.xlu0 %v3014_v4, %s2749_s11 }
 0x1e4   :  { %1407 = vmatpush.msra.mxu0 %v1375_v44  ;;  %v2457_v44 = vld [vmem:[%s3360_s14 + $0x40] sm:$0xff] }
 0x1e6   :  { %1408 = vmatpush.msra.mxu0 %v1373_v46  ;;  %v2456_v46 = vld [vmem:[%s3360_s14 + $0x38] sm:$0xff] }
 0x1e8   :  { %1409 = vmatpush.msra.mxu0 %v1371_v48  ;;  %v1582_v48 = vld [vmem:[%s3360_s14] sm:$0xff] }
 0x23e   :  { %v1181_v51 = vpop.f32.mrf.mxu0 }
 0x240   :  { %v1168_v53 = vpop.f32.mrf.mxu3 }
 0x241   :  { %v1169_v62 = vadd.f32 %v1168_v53, %v835_v60  ;;  %v1436_v53 = vld [vmem:[%s3358_s12 + $0x10] sm:$0xff]  ;;  %v1510_v60 = vld [vmem:[%s3359_s13 + $0x68] sm:$0xff] }
 0x243   :  { %v1182_v1 = vadd.f32 %v1181_v51, %v1169_v62  ;;  %v1440_v51 = vld [vmem:[%s3358_s12 + $0x30] sm:$0xff]  ;;  %v1509_v62 = vld [vmem:[%s3359_s13 + $0x60] sm:$0xff] }
 0x246   :  { %v1183_v58 = vpop.f32.mrf.mxu0 }
 0x247   :  { %v1511_v58 = vld [vmem:[%s3359_s13 + $0x70] sm:$0xff] }
 0x248   :  { %v1170_v59 = vpop.f32.mrf.mxu3  ;;  %1538 = vmatpush.msrb.mxu2 %v1511_v58  ;;  %v2461_v58 = vld [vmem:[%s3360_s14 + $0x50] sm:$0xff] }
 0x249   :  { %v1525_v59 = vld [vmem:[%s3359_s13 + $0xe0] sm:$0xff] }
 0x24a   :  { %v1194_v61 = vpop.f32.mrf.mxu1  ;;  %1539 = vmatpush.msrb.mxu2 %v1510_v60  ;;  %v2646_v60 = vld [vmem:[%s3353_s7 + $0x2] ss:$0 sm:$0xff] }
 0x24b   :  { %v1195_v3 = vadd.f32 %v1194_v61, %v1182_v1  ;;  %v1524_v61 = vld [vmem:[%s3359_s13 + $0xd8] sm:$0xff]  ;;  %v1522_v1 = vld [vmem:[%s3359_s13 + $0xc8] sm:$0xff] }
 0x24c   :  { %1540 = vmatpush.msrb.mxu2 %v1509_v62 }
 0x24e   :  { %v1233_v63 = vpop.f32.mrf.mxu0 }
 0x250   :  { %v1220_v0 = vpop.f32.mrf.mxu3 }
 0x251   :  { %v1221_v18 = vadd.f32 %v1220_v0, %v836_v11  ;;  %v1508_v0 = vld [vmem:[%s3359_s13 + $0x58] sm:$0xff] }
 0x252   :  { %v1196_v2 = vpop.f32.mrf.mxu1  ;;  %1541 = vmatpush.msrb.mxu2 %v1508_v0 }
 0x253   :  { %v1234_v20 = vadd.f32 %v1233_v63, %v1221_v18  ;;  %v1523_v63 = vld [vmem:[%s3359_s13 + $0xd0] sm:$0xff] }
 0x254   :  { %v1207_v5 = vpop.f32.mrf.mxu2  ;;  %v1507_v2 = vld [vmem:[%s3359_s13 + $0x50] sm:$0xff]  ;;  %v1579_v0 = vpop.permute.xlu0 %1578 }
 0x255   :  { %v1208_v6 = vadd.f32 %v1207_v5, %v1195_v3  ;;  %v1521_v3 = vld [vmem:[%s3359_s13 + $0xc0] sm:$0xff]  ;;  %v1506_v5 = vld [vmem:[%s3359_s13 + $0x48] sm:$0xff]  ;;  %1542 = vmatpush.msrb.mxu2 %v1507_v2 }
 0x256   :  { %v1235_v7 = vpop.f32.mrf.mxu0 }
 0x257   :  { %v1263_v8 = vadd.f32 %v1208_v6, %v3014_v4  ;;  %v1520_v6 = vld [vmem:[%s3359_s13 + $0xb8] sm:$0xff]  ;;  %v1505_v7 = vld [vmem:[%s3359_s13 + $0x40] sm:$0xff]  ;;  %1543 = vmatpush.msrb.mxu2 %v1506_v5 }
 0x258   :  { %v1222_v10 = vpop.f32.mrf.mxu3  ;;  %v1500_v4 = vld [vmem:[%s3359_s13 + $0x18] sm:$0xff] }
 0x259   :  { %vm1264_vm3 = vcmp.gt.f32.partialorder %v1263_v8, 0.0  ;;  %v1519_v8 = vld [vmem:[%s3359_s13 + $0xb0] sm:$0xff]  ;;  %v1518_v10 = vld [vmem:[%s3359_s13 + $0xa8] sm:$0xff]  ;;  %1544 = vmatpush.msrb.mxu2 %v1505_v7  ;;  %v2478_v5 = vld [vmem:[%s3360_s14 + $0xb8] sm:$0xff] }
 0x25a   :  { %v2435_v14 = vsel %vm1264_vm3, 1.0, %v2748_v13  ;;  %v1246_v15 = vpop.f32.mrf.mxu1  ;;  %v2476_v7 = vld [vmem:[%s3360_s14 + $0xa8] sm:$0xff] }
 0x25b   :  { %v3024_v16 = vmul.f32 %v2644_v9, %v2435_v14  ;;  %v1247_v22 = vadd.f32 %v1246_v15, %v1234_v20  ;;  %v1504_v9 = vld [vmem:[%s3359_s13 + $0x38] sm:$0xff]  ;;  %v1517_v14 = vld [vmem:[%s3359_s13 + $0xa0] sm:$0xff] }
 0x25c   :  { %v1209_v17 = vpop.f32.mrf.mxu2  ;;  %1545 = vmatpush.msrb.mxu2 %v1504_v9  ;;  %v1740_v9 = vld [vmem:[%s3361_s15] sm:$0x7f] }
 0x25d   :  { %v3027_v19 = vadd.f32 %v2645_v12, %v3024_v16  ;;  %v1503_v12 = vld [vmem:[%s3359_s13 + $0x30] sm:$0xff]  ;;  %v1516_v17 = vld [vmem:[%s3359_s13 + $0x98] sm:$0xff] }
 0x25e   :  { %1546 = vmatpush.msrb.mxu2 %v1503_v12  ;;  %v1780_v12 = vld [vmem:[%s3363_s17 + $0x10] sm:$0xff] }
 0x25f   :  { %2437 = vmatmul.msk.f32.vlgmr.msra.gmra.mxu3 %vm1278_vm4, %v3027_v19 }
 0x260   :  { %2444 = vmatpush.msk.msra.mxu3 %vm1282_vm1, %v1384_v29  ;;  %v1775_v29 = vld [vmem:[%s3362_s16 + $0x20] sm:$0xff] }
 0x262   :  { %v1248_v21 = vpop.f32.mrf.mxu1  ;;  %1424 = vmatpush.msra.mxu3 %v1382_v31  ;;  %v1774_v31 = vld [vmem:[%s3362_s16 + $0x18] sm:$0xff] }
 0x263   :  { %v1515_v21 = vld [vmem:[%s3359_s13 + $0x90] sm:$0xff] }
 0x264   :  { %v1259_v23 = vpop.f32.mrf.mxu2  ;;  %1425 = vmatpush.msra.mxu3 %v1380_v42 }
 0x265   :  { %v3031_v24 = vadd.f32 %v1259_v23, %v1247_v22  ;;  %v1514_v22 = vld [vmem:[%s3359_s13 + $0x88] sm:$0xff]  ;;  %v1501_v23 = vld [vmem:[%s3359_s13 + $0x20] sm:$0xff] }
 0x266   :  { %1426 = vmatpush.msra.mxu3 %v1378_v35  ;;  %v1585_v35 = vld [vmem:[%s3360_s14 + $0x18] sm:$0xff] }
 0x267   :  { %2449 = vmatmul.msk.f32.vlgmr.msrb.gmra.mxu1 %vm1444_vm5, %v3031_v24 }
 0x268   :  { %1427 = vmatpush.msra.mxu3 %v1376_v45  ;;  %v1584_v45 = vld [vmem:[%s3360_s14 + $0x10] sm:$0xff] }
 0x26a   :  { %1428 = vmatpush.msra.mxu3 %v1374_v47  ;;  %v2455_v47 = vld [vmem:[%s3360_s14 + $0x30] sm:$0xff] }
 0x26c   :  { %v1261_v25 = vpop.f32.mrf.mxu2  ;;  %1429 = vmatpush.msra.mxu3 %v1372_v49  ;;  %v2454_v49 = vld [vmem:[%s3360_s14 + $0x28] sm:$0xff] }
 0x26d   :  { %v1777_v25 = vld [vmem:[%s3362_s16 + $0x30] sm:$0x1] }
 0x2e2   :  { %v1303_v33 = vpop.f32.mrf.mxu3 }
 0x2e3   :  { %2662 = vrsqrt.f32 %v1303_v33  ;;  %vm1312_vm8 = vweird.f32 %v1303_v33 }
 0x2e9   :  { %v2663_v34 = vpop.eup %2662 }
 0x2ea   :  { %v1307_v36 = vmul.f32 %v2663_v34, %v1303_v33  ;;  %vm1313_vm7 = vweird.f32 %v2663_v34  ;;  %v1772_v33 = vld [vmem:[%s3362_s16 + $0x8] sm:$0xff] }
 0x2eb   :  { %vm1314_vm10 = vmor %vm1312_vm8, %vm1313_vm7 }
 0x2ec   :  { %v1308_v37 = vmul.f32 %v2663_v34, %v1307_v36  ;;  %v1586_v36 = vld [vmem:[%s3360_s14 + $0x20] sm:$0x7] }
 0x2ee   :  { %v1309_v38 = vmul.f32 0.5, %v1308_v37  ;;  %v2458_v37 = vld [vmem:[%s3360_s14 + $0x48] sm:$0x7] }
 0x2ef   :  { %2459 = vmatpush.msk.msra.mxu1 %vm1448_vm2, %v2458_v37 }
 0x2f0   :  { %v1310_v39 = vsub.f32 1.5, %v1309_v38 }
 0x2f1   :  { %1634 = vmatpush.msra.mxu1 %v2457_v44 }
 0x2f2   :  { %v1311_v40 = vmul.f32 %v2663_v34, %v1310_v39  ;;  %v1492_v39 = vpop.f32.mrf.mxu1 }
 0x2f3   :  { %1635 = vmatpush.msra.mxu1 %v2456_v46 }
 0x2f4   :  { %v1315_v41 = vsel %vm1314_vm10, %v2663_v34, %v1311_v40  ;;  %v1771_v34 = vld [vmem:[%s3362_s16] sm:$0xff] }
 0x2f5   :  { %2439 = vmatmul.msk.f32.vlgmr.msrb.gmra.mxu0 %vm1317_vm9, %v1315_v41  ;;  %2441 = vmatmul.msk.f32.vlgmr.msrb.gmra.mxu3 %vm1317_vm9, %v1315_v41 }
 0x2f6   :  { %2446 = vmatpush.msk.msrb.mxu0 %vm1448_vm2, %v1442_v50  ;;  %2450 = vmatpush.msk.msrb.mxu3 %vm1533_vm11, %v1527_v55  ;;  %v2465_v50 = vld [vmem:[%s3360_s14 + $0x70] sm:$0x7]  ;;  %v2470_v55 = vld [vmem:[%s3360_s14 + $0x88] sm:$0xff] }
 0x2f7   :  { %1636 = vmatpush.msra.mxu1 %v2455_v47 }
 0x2f8   :  { %1467 = vmatpush.msrb.mxu0 %v1440_v51  ;;  %1559 = vmatpush.msrb.mxu3 %v1526_v56  ;;  %v2472_v51 = vld [vmem:[%s3360_s14 + $0x98] sm:$0x7] }
 0x2f9   :  { %1637 = vmatpush.msra.mxu1 %v2454_v49  ;;  %v2462_v56 = vld [vmem:[%s3360_s14 + $0x58] sm:$0xff] }
 0x2fa   :  { %1468 = vmatpush.msrb.mxu0 %v1438_v52  ;;  %1560 = vmatpush.msrb.mxu3 %v1525_v59  ;;  %v2464_v52 = vld [vmem:[%s3360_s14 + $0x68] sm:$0xff]  ;;  %v2468_v59 = vld [vmem:[%s3360_s14 + $0x78] sm:$0xff] }
 0x2fb   :  { %2473 = vmatpush.msk.msrb.mxu1 %vm1448_vm2, %v2472_v51 }
 0x2fc   :  { %1469 = vmatpush.msrb.mxu0 %v1436_v53  ;;  %1561 = vmatpush.msrb.mxu3 %v1524_v61  ;;  %v2471_v53 = vld [vmem:[%s3360_s14 + $0x90] sm:$0xff] }
 0x2fd   :  { %1698 = vmatpush.msrb.mxu1 %v2471_v53 }
 0x2fe   :  { %1470 = vmatpush.msrb.mxu0 %v1434_v54  ;;  %1562 = vmatpush.msrb.mxu3 %v1523_v63  ;;  %v2463_v54 = vld [vmem:[%s3360_s14 + $0x60] sm:$0xff] }
 0x2ff   :  { %1699 = vmatpush.msrb.mxu1 %v2470_v55 }
 0x300   :  { %1563 = vmatpush.msrb.mxu3 %v1522_v1 }
 0x301   :  { %1700 = vmatpush.msrb.mxu1 %v2469_v57 }
 0x302   :  { %1564 = vmatpush.msrb.mxu3 %v1521_v3  ;;  %v2479_v3 = vld [vmem:[%s3360_s14 + $0xc0] sm:$0x7] }
 0x303   :  { %1701 = vmatpush.msrb.mxu1 %v2468_v59 }
 0x304   :  { %1565 = vmatpush.msrb.mxu3 %v1520_v6  ;;  %v2477_v6 = vld [vmem:[%s3360_s14 + $0xb0] sm:$0xff] }
 0x306   :  { %1566 = vmatpush.msrb.mxu3 %v1519_v8  ;;  %v2475_v8 = vld [vmem:[%s3360_s14 + $0xa0] sm:$0xff] }
 0x308   :  { %1567 = vmatpush.msrb.mxu3 %v1518_v10  ;;  %v1782_v10 = vld [vmem:[%s3363_s17 + $0x20] sm:$0x7] }
 0x30a   :  { %1568 = vmatpush.msrb.mxu3 %v1517_v14 }
 0x30c   :  { %1569 = vmatpush.msrb.mxu3 %v1516_v17 }
 0x30e   :  { %1570 = vmatpush.msrb.mxu3 %v1515_v21 }
 0x310   :  { %1571 = vmatpush.msrb.mxu3 %v1514_v22 }
 0x372   :  { %v1342_v11 = vpop.f32.mrf.mxu0 }
 0x373   :  { %v1345_v15 = vmul.f32 %v1342_v11, %v3027_v19  ;;  %v1502_v19 = vld [vmem:[%s3359_s13 + $0x28] sm:$0xff]  ;;  %v1781_v11 = vld [vmem:[%s3363_s17 + $0x18] sm:$0xff] }
 0x374   :  { %1547 = vmatpush.msrb.mxu2 %v1502_v19 }
 0x376   :  { %1548 = vmatpush.msrb.mxu2 %v1501_v23 }
 0x378   :  { %v1367_v18 = vpop.f32.mrf.mxu3  ;;  %1549 = vmatpush.msrb.mxu2 %v1500_v4 }
 0x379   :  { %v1370_v20 = vmul.f32 %v1367_v18, %v1345_v15 }
 0x37a   :  { %1550 = vmatpush.msrb.mxu2 %v1499_v26  ;;  %v1779_v26 = vld [vmem:[%s3363_s17 + $0x8] sm:$0xff] }
 0x37b   :  { %2443 = vmatmul.msk.f32.vlgmr.msra.gmra.mxu0 %vm1278_vm4, %v1370_v20  ;;  %2445 = vmatmul.msk.f32.vlgmr.msra.gmra.mxu3 %vm1278_vm4, %v1370_v20 }
 0x37c   :  { %1551 = vmatpush.msrb.mxu2 %v1498_v28  ;;  %2452 = vmatpush.msk.msra.mxu0 %vm1448_vm2, %v1586_v36  ;;  %v2647_v28 = vld [vmem:[%s3353_s7 + $0x3] ss:$0 sm:$0xff] }
 0x37e   :  { %1552 = vmatpush.msrb.mxu2 %v1497_v30  ;;  %1605 = vmatpush.msra.mxu0 %v1585_v35 }
 0x380   :  { %1606 = vmatpush.msra.mxu0 %v1584_v45  ;;  %2482 = vmatpush.msk.msra.mxu2 %vm1321_vm6, %v1740_v9 }
 0x383   :  { %2447 = vmatmul.msk.f32.vlgmr.msrb.gmra.mxu0 %vm1444_vm5, %v3031_v24  ;;  %v1513_v24 = vld [vmem:[%s3359_s13 + $0x80] sm:$0xff] }
 0x384   :  { %1572 = vmatpush.msrb.mxu3 %v1513_v24 }
 0x386   :  { %2487 = vmatpush.msk.msra.mxu3 %vm1282_vm1, %v1777_v25 }
 0x388   :  { %1825 = vmatpush.msra.mxu3 %v1776_v27  ;;  %v1778_v27 = vld [vmem:[%s3363_s17] sm:$0xff] }
 0x38a   :  { %1826 = vmatpush.msra.mxu3 %v1775_v29 }
 0x38c   :  { %1827 = vmatpush.msra.mxu3 %v1774_v31 }
 0x38e   :  { %1828 = vmatpush.msra.mxu3 %v1773_v32 }
 0x390   :  { %1829 = vmatpush.msra.mxu3 %v1772_v33 }
 0x392   :  { %1830 = vmatpush.msra.mxu3 %v1771_v34 }
 0x3f8   :  { %v1411_v38 = vpop.f32.mrf.mxu0 }
 0x3fe   :  { %v1431_v40 = vpop.f32.mrf.mxu3 }
 0x3ff   :  { %v1496_v41 = vmul.f32 %v1492_v39, %v1431_v40 }
 0x400   :  { %v1472_v42 = vpop.f32.mrf.mxu0 }
 0x401   :  { %v1495_v43 = vmul.f32 %v1472_v42, %v1411_v38  ;;  %2451 = vmatmul.msk.f32.vlgmr.msrb.gmra.mxu3 %vm1529_vm12, %v1496_v41 }
 0x403   :  { %1553 = vmatmul.f32.vlgmr.msrb.gmra.mxu2 %v1495_v43 }
 0x409   :  { %2488 = vmatmul.msk.f32.vlgmr.msra.gmra.mxu3 %vm1278_vm4, %v3024_v16  ;;  %v1583_v16 = vld [vmem:[%s3360_s14 + $0x8] sm:$0xff] }
 0x40a   :  { %1607 = vmatpush.msra.mxu0 %v1583_v16 }
 0x40c   :  { %1608 = vmatpush.msra.mxu0 %v1582_v48 }
 0x40e   :  { %2466 = vmatpush.msk.msrb.mxu0 %vm1448_vm2, %v2465_v50 }
 0x410   :  { %1666 = vmatpush.msrb.mxu0 %v2464_v52 }
 0x412   :  { %1667 = vmatpush.msrb.mxu0 %v2463_v54 }
 0x414   :  { %1668 = vmatpush.msrb.mxu0 %v2462_v56 }
 0x416   :  { %1669 = vmatpush.msrb.mxu0 %v2461_v58 }
 0x484   :  { %v1574_v63 = vpop.f32.mrf.mxu3 }
 0x486   :  { %v1554_v61 = vpop.f32.mrf.mxu2 }
 0x487   :  { %v1555_v62 = vadd.f32 %v2646_v60, %v1554_v61 }
 0x489   :  { %v1575_v1 = vadd.f32 %v1574_v63, %v1555_v62 }
 0x48b   :  { %v1581_v2 = vadd.f32 %v1579_v0, %v1575_v1 }
 0x48c   :  { %v1832_v31 = vpop.f32.mrf.mxu3 }
 0x48d   :  { %2453 = vmatmul.msk.f32.vlgmr.msra.gmra.mxu0 %vm1444_vm5, %v1581_v2  ;;  %2460 = vmatmul.msk.f32.vlgmr.msra.gmra.mxu1 %vm1444_vm5, %v1581_v2 }
 0x48e   :  { %2480 = vmatpush.msk.msra.mxu0 %vm1448_vm2, %v2479_v3  ;;  %2485 = vmatpush.msk.msra.mxu1 %vm1448_vm2, %v1782_v10 }
 0x490   :  { %1730 = vmatpush.msra.mxu0 %v2478_v5  ;;  %1801 = vmatpush.msra.mxu1 %v1781_v11 }
 0x492   :  { %1731 = vmatpush.msra.mxu0 %v2477_v6  ;;  %1802 = vmatpush.msra.mxu1 %v1780_v12 }
 0x494   :  { %1732 = vmatpush.msra.mxu0 %v2476_v7  ;;  %1803 = vmatpush.msra.mxu1 %v1779_v26 }
 0x495   :  { %2467 = vmatmul.msk.f32.vlgmr.msrb.gmra.mxu0 %vm1444_vm5, %v1581_v2  ;;  %2474 = vmatmul.msk.f32.vlgmr.msrb.gmra.mxu1 %vm1444_vm5, %v1581_v2 }
 0x496   :  { %1733 = vmatpush.msra.mxu0 %v2475_v8  ;;  %1804 = vmatpush.msra.mxu1 %v1778_v27 }
 0x49d   :  { %2481 = vmatmul.msk.f32.vlgmr.msra.gmra.mxu0 %vm1444_vm5, %v1581_v2 }
 0x50a   :  { %v1610_v14 = vpop.f32.mrf.mxu0  ;;  %v1639_v15 = vpop.f32.mrf.mxu1 }
 0x50b   :  { %vm1642_vm13 = vcmp.gt.f32.partialorder %v1639_v15, %v1610_v14 }
 0x50c   :  { %v1643_v17 = vsel %vm1642_vm13, %v1639_v15, %v1610_v14  ;;  %v1644_v19 = vsel %vm1642_vm13, 1.0, %v2748_v13 }
 0x512   :  { %v1671_v18 = vpop.f32.mrf.mxu0  ;;  %v1703_v21 = vpop.f32.mrf.mxu1 }
 0x513   :  { %vm1674_vm14 = vcmp.gt.f32.partialorder %v1671_v18, %v1643_v17 }
 0x514   :  { %v1675_v20 = vsel %vm1674_vm14, %v1671_v18, %v1643_v17  ;;  %v1676_v22 = vsel %vm1674_vm14, 2.0, %v1644_v19 }
 0x515   :  { %vm1706_vm15 = vcmp.gt.f32.partialorder %v1703_v21, %v1675_v20 }
 0x516   :  { %v1707_v23 = vsel %vm1706_vm15, %v1703_v21, %v1675_v20  ;;  %v1708_v4 = vsel %vm1706_vm15, 3.0, %v1676_v22 }
 0x51a   :  { %v1735_v24 = vpop.f32.mrf.mxu0 }
 0x51b   :  { %vm1738_vm0 = vcmp.gt.f32.partialorder %v1735_v24, %v1707_v23 }
 0x51c   :  { %v1739_v25 = vsel %vm1738_vm0, 4.0, %v1708_v4 }
 0x51d   :  { %2483 = vmatmul.msk.f32.vlgmr.msra.gmra.mxu2 %vm1317_vm9, %v1739_v25 }
 0x5a0   :  { %v1764_v29 = vpop.f32.mrf.mxu2 }
 0x5a1   :  { %vm1768_vm1 = vcmp.eq.f32.partialorder %v1764_v29, %v2647_v28 }
 0x5a2   :  { %v2484_v30 = vsel %vm1768_vm1, 1.0, %v2748_v13 }
 0x5a3   :  { %2486 = vmatmul.msk.f32.vlgmr.msra.gmra.mxu1 %vm1444_vm5, %v2484_v30 }
 0x620   :  { %v1806_v32 = vpop.f32.mrf.mxu1 }
 0x621   :  { %v1833_v33 = vadd.f32 %v1832_v31, %v1806_v32 }
 0x623   :  { %1835 = vst [vmem:[#allocation7] sm:$0xff] %v1833_v33 }
 0x624   :  { %1846 = dma.vmem_to_hbm [thread:$0]  %s1842_s21, 128, %s1844_s23, [#allocation4]  }
 0x625   :  { %2740 = dma.done.wait [#allocation4], 128  }
 0x626   :  { %2741 = vsyncadd [#allocation4], 4294967168 }
 0x627   :  { %1851 = vsyncpa [#allocation3], 1 }
 0x628   :  { %1852 = vsyncpa [#allocation6], 1 }
 0x629   :  { %1853 = vsyncpa [#allocation4], 1 }

</bundles_post_ra>
